<compile_context>
chip_gen: v7x
topology: tpu7x:2x2x1
jax: 0.10.0
libtpu: 0.0.40
codegen_flags: <defaults>
</compile_context>

<pallas_src>
import functools
import math

import jax
import jax.numpy as jnp
import numpy as np
from jax.experimental import pallas as pl
from jax.experimental.pallas import tpu as pltpu

# ----------------------------- small RoBERTa config -----------------------------
VOCAB = 100
HIDDEN = 128
N_LAYERS = 2
N_HEADS = 4
HEAD_DIM = HIDDEN // N_HEADS        # 32
INTERMEDIATE = 256
MAX_POS = 66                        # position table; sequences > MAX_POS-2 would clamp
PAD_ID = 1                          # roberta padding_idx
LN_EPS = 1e-5
MASK_NEG = -1e9
GELU_C = math.sqrt(2.0 / math.pi)


# ----------------------------- in-kernel helpers ---------------------------------
def _layer_norm(x, g, b):
    # f32 statistics (keep LN in f32 even with bf16 matmul operands)
    mu = jnp.mean(x, axis=-1, keepdims=True)
    var = jnp.mean(jnp.square(x - mu), axis=-1, keepdims=True)
    return (x - mu) * jax.lax.rsqrt(var + LN_EPS) * g + b


def _gelu(y):
    # TODO(synk): HF Roberta uses exact erf GELU; tanh approximation kept here because
    # lax.erf lowering inside Mosaic is not guaranteed (difference ~1e-3).
    return 0.5 * y * (1.0 + jnp.tanh(GELU_C * (y + 0.044715 * y * y * y)))


# ----------------------------- fused Pallas kernel --------------------------------
def roberta_fused_kernel(lens_ref,                      # scalar-prefetch: (B,) int32 in SMEM
                         emb_ref,                       # (B*S, H) f32 raw embedding sum
                         emb_g_ref, emb_b_ref,          # (1,H) f32 embedding LayerNorm
                         qkv_w_ref, qkv_b_ref,          # (1,H,3H) bf16 / (1,1,3H) f32
                         o_w_ref, o_b_ref,              # (1,H,H)  bf16 / (1,1,H)  f32
                         ln1_g_ref, ln1_b_ref,          # (1,1,H) f32
                         ff1_w_ref, ff1_b_ref,          # (1,H,I) bf16 / (1,1,I) f32
                         ff2_w_ref, ff2_b_ref,          # (1,I,H) bf16 / (1,1,H) f32
                         ln2_g_ref, ln2_b_ref,          # (1,1,H) f32
                         pool_w_ref, pool_b_ref,        # (H,H) bf16 / (1,H) f32
                         hid_ref,                       # (B*S, H) f32, resident across layers
                         pool_ref,                      # (B, H) f32, written at last layer
                         *, batch, seq):
    l = pl.program_id(0)

    # grid step 0: embedding LayerNorm seeds the resident hidden-state block (fused emb-LN)
    @pl.when(l == 0)
    def _():
        hid_ref[...] = _layer_norm(emb_ref[...], emb_g_ref[...], emb_b_ref[...])

    x = hid_ref[...]                                    # (B*S, H) f32 layer input / residual
    x_bf = x.astype(jnp.bfloat16)

    # fused Q|K|V projection: one 128x384 (lane-dense) bf16 MXU matmul
    qkv = jnp.dot(x_bf, qkv_w_ref[0],
                  preferred_element_type=jnp.float32) + qkv_b_ref[0]    # (B*S, 3H) f32

    q = qkv[:, :HIDDEN]                                 # 128-lane aligned section slices
    k = qkv[:, HIDDEN:2 * HIDDEN]
    v = qkv[:, 2 * HIDDEN:]

    def split_heads(x2d):
        # (B*S, H) -> (B*NH, S, Dh), batch-major group ordering (b, h).
        # Reshapes only split/merge leading (sublane) dims; trailing dims untouched.
        parts = [x2d[:, h * HEAD_DIM:(h + 1) * HEAD_DIM]
                 .reshape(batch, 1, seq, HEAD_DIM) for h in range(N_HEADS)]
        return (jnp.concatenate(parts, axis=1)
                .reshape(batch * N_HEADS, seq, HEAD_DIM))

    qh = split_heads(q).astype(jnp.bfloat16)
    kh = split_heads(k).astype(jnp.bfloat16)
    vh = split_heads(v).astype(jnp.bfloat16)

    # additive key-padding bias built in-register from scalar-prefetched lengths
    # (mask assumed to be a contiguous prefix of ones, as produced by the tokenizer)
    col = jax.lax.broadcasted_iota(jnp.int32, (1, 1, seq), 2)
    bias = jnp.concatenate(
        [jnp.where(col < lens_ref[b], 0.0, MASK_NEG) for b in range(batch)], axis=0)
    bias = (jnp.broadcast_to(bias[:, None], (batch, N_HEADS, 1, seq))
            .reshape(batch * N_HEADS, 1, seq))                         # (B*NH, 1, S)

    # batched attention: one QK^T einsum, one softmax chain, one PV einsum
    scale = 1.0 / math.sqrt(HEAD_DIM)
    s = jnp.einsum('gqd,gkd->gqk', qh, kh,
                   preferred_element_type=jnp.float32) * scale + bias   # (B*NH, S, S)
    m = jnp.max(s, axis=-1, keepdims=True)
    e = jnp.exp(s - m)
    p = e * pl.reciprocal(jnp.sum(e, axis=-1, keepdims=True), approx=True)
    ctx_h = jnp.einsum('gqk,gkd->gqd', p.astype(jnp.bfloat16), vh,
                       preferred_element_type=jnp.float32)              # (B*NH, S, Dh)

    # merge heads back into a lane-dense (B*S, H) block
    ctx4 = ctx_h.reshape(batch, N_HEADS, seq, HEAD_DIM)
    ctx = (jnp.concatenate([ctx4[:, h] for h in range(N_HEADS)], axis=-1)
           .reshape(batch * seq, HIDDEN))

    # output projection + residual + LayerNorm (fused epilogue)
    attn = jnp.dot(ctx.astype(jnp.bfloat16), o_w_ref[0],
                   preferred_element_type=jnp.float32) + o_b_ref[0]
    h1 = _layer_norm(attn + x, ln1_g_ref[0], ln1_b_ref[0])

    # feed-forward: FF1 + GELU, FF2 + residual + LayerNorm (fused epilogue)
    ff = _gelu(jnp.dot(h1.astype(jnp.bfloat16), ff1_w_ref[0],
                       preferred_element_type=jnp.float32) + ff1_b_ref[0])
    ff2 = jnp.dot(ff.astype(jnp.bfloat16), ff2_w_ref[0],
                  preferred_element_type=jnp.float32) + ff2_b_ref[0]
    h2 = _layer_norm(ff2 + h1, ln2_g_ref[0], ln2_b_ref[0])
    hid_ref[...] = h2

    # last grid step: fused pooler -> tanh(CLS @ pool_w + pool_b), second lane-dense output
    @pl.when(l == pl.num_programs(0) - 1)
    def _():
        cls = jnp.concatenate(
            [h2[b * seq:b * seq + 1, :] for b in range(batch)], axis=0)  # (B, H)
        y = jnp.dot(cls.astype(jnp.bfloat16), pool_w_ref[...],
                    preferred_element_type=jnp.float32) + pool_b_ref[...]
        pool_ref[...] = jnp.tanh(y)


# ----------------------------- Pallas wrapper -------------------------------------
def roberta_encoder(emb, lengths, p, *, batch, seq):
    BS, H = emb.shape

    def layer_spec(shape):
        return pl.BlockSpec(shape, lambda l, lens: (l, 0, 0))

    def const_spec(shape):
        return pl.BlockSpec(shape, lambda l, lens: (0, 0))

    grid_spec = pltpu.PrefetchScalarGridSpec(
        num_scalar_prefetch=1,                  # lengths -> SMEM
        grid=(N_LAYERS,),
        in_specs=[
            const_spec((BS, H)),                                   # emb (pre-LN)
            const_spec((1, H)), const_spec((1, H)),                # emb LN g/b
            layer_spec((1, H, 3 * H)), layer_spec((1, 1, 3 * H)),  # qkv w/b
            layer_spec((1, H, H)), layer_spec((1, 1, H)),          # o   w/b
            layer_spec((1, 1, H)), layer_spec((1, 1, H)),          # ln1 g/b
            layer_spec((1, H, INTERMEDIATE)),                      # ff1 w
            layer_spec((1, 1, INTERMEDIATE)),                      # ff1 b
            layer_spec((1, INTERMEDIATE, H)), layer_spec((1, 1, H)),  # ff2 w/b
            layer_spec((1, 1, H)), layer_spec((1, 1, H)),          # ln2 g/b
            const_spec((H, H)), const_spec((1, H)),                # pooler w/b
        ],
        # same output blocks every layer -> hidden + pooled stay resident in VMEM
        out_specs=[
            const_spec((BS, H)),
            const_spec((batch, H)),
        ],
    )

    kern = functools.partial(roberta_fused_kernel, batch=batch, seq=seq)
    hidden, pooled = pl.pallas_call(
        kern,
        out_shape=(jax.ShapeDtypeStruct((BS, H), jnp.float32),
                   jax.ShapeDtypeStruct((batch, H), jnp.float32)),
        grid_spec=grid_spec,
        compiler_params=pltpu.CompilerParams(dimension_semantics=("arbitrary",)),
    )(lengths, emb, p["emb_ln_g"], p["emb_ln_b"],
      p["qkv_w"], p["qkv_b"], p["o_w"], p["o_b"],
      p["ln1_g"], p["ln1_b"], p["ff1_w"], p["ff1_b"],
      p["ff2_w"], p["ff2_b"], p["ln2_g"], p["ln2_b"],
      p["pool_w"], p["pool_b"])
    return hidden, pooled


# ----------------------------- parameters ----------------------------------------
def init_params(key):
    ks = jax.random.split(key, 8)

    def w(k, shape, dtype=jnp.bfloat16):
        # matmul weights stored bf16 (MXU-native); everything else f32
        return (jax.random.normal(k, shape, jnp.float32) * 0.02).astype(dtype)

    params = {
        "word_emb": w(ks[0], (VOCAB, HIDDEN), jnp.float32),
        "pos_emb": w(ks[1], (MAX_POS, HIDDEN), jnp.float32),
        "type_emb": w(ks[2], (1, HIDDEN), jnp.float32),
        "emb_ln_g": jnp.ones((1, HIDDEN), jnp.float32),
        "emb_ln_b": jnp.zeros((1, HIDDEN), jnp.float32),
        # stacked per-layer weights (leading axis = layer)
        "qkv_w": w(ks[3], (N_LAYERS, HIDDEN, 3 * HIDDEN)),      # Q|K|V fused
        "qkv_b": jnp.zeros((N_LAYERS, 1, 3 * HIDDEN), jnp.float32),
        "o_w": w(ks[4], (N_LAYERS, HIDDEN, HIDDEN)),
        "o_b": jnp.zeros((N_LAYERS, 1, HIDDEN), jnp.float32),
        "ln1_g": jnp.ones((N_LAYERS, 1, HIDDEN), jnp.float32),
        "ln1_b": jnp.zeros((N_LAYERS, 1, HIDDEN), jnp.float32),
        "ff1_w": w(ks[5], (N_LAYERS, HIDDEN, INTERMEDIATE)),
        "ff1_b": jnp.zeros((N_LAYERS, 1, INTERMEDIATE), jnp.float32),
        "ff2_w": w(ks[6], (N_LAYERS, INTERMEDIATE, HIDDEN)),
        "ff2_b": jnp.zeros((N_LAYERS, 1, HIDDEN), jnp.float32),
        "ln2_g": jnp.ones((N_LAYERS, 1, HIDDEN), jnp.float32),
        "ln2_b": jnp.zeros((N_LAYERS, 1, HIDDEN), jnp.float32),
        "pool_w": w(ks[7], (HIDDEN, HIDDEN)),
        "pool_b": jnp.zeros((1, HIDDEN), jnp.float32),
    }
    return params


# ----------------------------- model forward -------------------------------------
@jax.jit
def roberta_lm_forward(params, input_ids, attention_mask):
    """Returns (last_hidden_state (B,S,H), pooler_output (B,H)) — one fused pallas_call."""
    B, S = input_ids.shape

    # RoBERTa position ids: cumsum over non-pad tokens, offset by padding_idx.
    # NOTE: valid for sequences up to MAX_POS - PAD_ID - 1 tokens (jnp.take clamps beyond).
    not_pad = (input_ids != PAD_ID).astype(jnp.int32)
    position_ids = jnp.cumsum(not_pad, axis=1) * not_pad + PAD_ID

    word = jnp.take(params["word_emb"], input_ids, axis=0)           # (B,S,H)
    pos = jnp.take(params["pos_emb"], position_ids, axis=0)          # (B,S,H)
    tok = params["type_emb"][0][None, None, :]                       # (1,1,H)
    emb = (word + pos + tok).reshape(B * S, HIDDEN)                  # pre-LN embedding sum

    # per-sequence lengths (mask is a contiguous prefix of ones); stays on device
    lengths = jnp.sum(attention_mask, axis=-1).astype(jnp.int32)     # (B,)

    hidden, pooled = roberta_encoder(emb, lengths, params, batch=B, seq=S)
    return hidden.reshape(B, S, HIDDEN), pooled


def roberta_module_forward(params, input_ids, attention_mask):
    """Mirrors Roberta.forward: returns {'text_emb', 'hidden', 'mask'}."""
    # host-side glue (dynamic shapes) computed BEFORE launching the device forward,
    # so it does not force a device->host sync mid-pipeline.
    am_np = np.asarray(attention_mask)
    has_pad = am_np.min(axis=-1) == 0
    # original module uses argmin(); fixed here so all-ones rows keep their full length
    lengths = np.where(has_pad, am_np.argmin(axis=-1), am_np.shape[1])
    max_len = int(lengths.max())
    mask = np.arange(max_len)[None, :] < lengths[:, None]            # (B, max_len) bool

    hidden, pooled = roberta_lm_forward(
        params, jnp.asarray(input_ids, jnp.int32), jnp.asarray(attention_mask, jnp.int32))

    if max_len < hidden.shape[1]:
        hidden = hidden[:, :max_len]
    return {"text_emb": pooled, "hidden": hidden, "mask": jnp.asarray(mask)}


# ----------------------------- demo ----------------------------------------------
if __name__ == "__main__":
    key = jax.random.PRNGKey(0)
    pkey, ikey = jax.random.split(key)
    params = init_params(pkey)

    B, S = 2, 8
    # synthetic "tokenized" batch with per-sequence lengths 6 and 5 (rest is padding)
    seq_lengths = np.array([6, 5], dtype=np.int32)
    attention_mask = (np.arange(S)[None, :] < seq_lengths[:, None]).astype(np.int32)
    ids = np.array(jax.random.randint(ikey, (B, S), 3, VOCAB, dtype=jnp.int32))  # writable copy
    ids[:, 0] = 0                                   # BOS
    ids = np.where(attention_mask == 1, ids, PAD_ID).astype(np.int32)

    out = roberta_module_forward(params, ids, attention_mask)
    jax.block_until_ready((out["text_emb"], out["hidden"], out["mask"]))

    assert out["text_emb"].shape == (B, HIDDEN)
    assert out["hidden"].shape == (B, int(seq_lengths.max()), HIDDEN)
    assert out["mask"].shape == (B, int(seq_lengths.max()))
    print("KERNEL_OK")
</pallas_src>

<mosaic_0001>
module attributes {stable_mosaic.version = 11 : i64} {
  func.func @roberta_fused_kernel(%arg0: i32, %arg1: memref<2xi32, #tpu.memory_space<smem>>, %arg2: memref<16x128xf32, #tpu.memory_space<vmem>>, %arg3: memref<1x128xf32, #tpu.memory_space<vmem>>, %arg4: memref<1x128xf32, #tpu.memory_space<vmem>>, %arg5: memref<1x128x384xbf16, #tpu.memory_space<vmem>>, %arg6: memref<1x1x384xf32, #tpu.memory_space<vmem>>, %arg7: memref<1x128x128xbf16, #tpu.memory_space<vmem>>, %arg8: memref<1x1x128xf32, #tpu.memory_space<vmem>>, %arg9: memref<1x1x128xf32, #tpu.memory_space<vmem>>, %arg10: memref<1x1x128xf32, #tpu.memory_space<vmem>>, %arg11: memref<1x128x256xbf16, #tpu.memory_space<vmem>>, %arg12: memref<1x1x256xf32, #tpu.memory_space<vmem>>, %arg13: memref<1x256x128xbf16, #tpu.memory_space<vmem>>, %arg14: memref<1x1x128xf32, #tpu.memory_space<vmem>>, %arg15: memref<1x1x128xf32, #tpu.memory_space<vmem>>, %arg16: memref<1x1x128xf32, #tpu.memory_space<vmem>>, %arg17: memref<128x128xbf16, #tpu.memory_space<vmem>>, %arg18: memref<1x128xf32, #tpu.memory_space<vmem>>, %arg19: memref<16x128xf32, #tpu.memory_space<vmem>>, %arg20: memref<2x128xf32, #tpu.memory_space<vmem>>) attributes {dimension_semantics = [#tpu.dimension_semantics<arbitrary>], iteration_bounds = array<i64: 2>, scalar_prefetch = 1 : i64, scratch_operands = 0 : i64, tpu.core_type = #tpu.core_type<tc>, window_params = [{pipeline_mode = #tpu.pipeline_mode<synchronous>, transform_indices = @transform_0, window_bounds = array<i64: 16, 128>}, {pipeline_mode = #tpu.pipeline_mode<synchronous>, transform_indices = @transform_1, window_bounds = array<i64: 1, 128>}, {pipeline_mode = #tpu.pipeline_mode<synchronous>, transform_indices = @transform_2, window_bounds = array<i64: 1, 128>}, {transform_indices = @transform_3, window_bounds = array<i64: 1, 128, 384>}, {transform_indices = @transform_4, window_bounds = array<i64: 1, 1, 384>}, {transform_indices = @transform_5, window_bounds = array<i64: 1, 128, 128>}, {transform_indices = @transform_6, window_bounds = array<i64: 1, 1, 128>}, {transform_indices = @transform_7, window_bounds = array<i64: 1, 1, 128>}, {transform_indices = @transform_8, window_bounds = array<i64: 1, 1, 128>}, {transform_indices = @transform_9, window_bounds = array<i64: 1, 128, 256>}, {transform_indices = @transform_10, window_bounds = array<i64: 1, 1, 256>}, {transform_indices = @transform_11, window_bounds = array<i64: 1, 256, 128>}, {transform_indices = @transform_12, window_bounds = array<i64: 1, 1, 128>}, {transform_indices = @transform_13, window_bounds = array<i64: 1, 1, 128>}, {transform_indices = @transform_14, window_bounds = array<i64: 1, 1, 128>}, {pipeline_mode = #tpu.pipeline_mode<synchronous>, transform_indices = @transform_15, window_bounds = array<i64: 128, 128>}, {pipeline_mode = #tpu.pipeline_mode<synchronous>, transform_indices = @transform_16, window_bounds = array<i64: 1, 128>}, {pipeline_mode = #tpu.pipeline_mode<synchronous>, transform_indices = @transform_17, window_bounds = array<i64: 16, 128>}, {pipeline_mode = #tpu.pipeline_mode<synchronous>, transform_indices = @transform_18, window_bounds = array<i64: 2, 128>}]} {
    %c0_i32 = arith.constant 0 : i32
    %0 = arith.cmpi eq, %arg0, %c0_i32 : i32
    %1 = arith.extui %0 : i1 to i32
    %c0_i32_0 = arith.constant 0 : i32
    %2 = arith.cmpi ne, %1, %c0_i32_0 : i32
    scf.if %2 {
      %c0_68 = arith.constant 0 : index
      %c0_69 = arith.constant 0 : index
      %189 = vector.load %arg2[%c0_68, %c0_69] : memref<16x128xf32, #tpu.memory_space<vmem>>, vector<16x128xf32>
      %c0_70 = arith.constant 0 : index
      %c0_71 = arith.constant 0 : index
      %190 = vector.load %arg3[%c0_70, %c0_71] : memref<1x128xf32, #tpu.memory_space<vmem>>, vector<1x128xf32>
      %c0_72 = arith.constant 0 : index
      %c0_73 = arith.constant 0 : index
      %191 = vector.load %arg4[%c0_72, %c0_73] : memref<1x128xf32, #tpu.memory_space<vmem>>, vector<1x128xf32>
      %cst_74 = arith.constant dense<0.000000e+00> : vector<16xf32>
      %192 = vector.multi_reduction <add>, %189, %cst_74 [1] : vector<16x128xf32> to vector<16xf32>
      %193 = vector.shape_cast %192 : vector<16xf32> to vector<16x1xf32>
      %cst_75 = arith.constant 1.280000e+02 : f32
      %194 = vector.broadcast %cst_75 : f32 to vector<16x1xf32>
      %195 = arith.divf %193, %194 : vector<16x1xf32>
      %196 = vector.broadcast %195 : vector<16x1xf32> to vector<16x128xf32>
      %197 = arith.subf %189, %196 : vector<16x128xf32>
      %198 = arith.mulf %197, %197 : vector<16x128xf32>
      %cst_76 = arith.constant dense<0.000000e+00> : vector<16xf32>
      %199 = vector.multi_reduction <add>, %198, %cst_76 [1] : vector<16x128xf32> to vector<16xf32>
      %200 = vector.shape_cast %199 : vector<16xf32> to vector<16x1xf32>
      %cst_77 = arith.constant 1.280000e+02 : f32
      %201 = vector.broadcast %cst_77 : f32 to vector<16x1xf32>
      %202 = arith.divf %200, %201 : vector<16x1xf32>
      %203 = vector.broadcast %195 : vector<16x1xf32> to vector<16x128xf32>
      %204 = arith.subf %189, %203 : vector<16x128xf32>
      %cst_78 = arith.constant 9.99999974E-6 : f32
      %205 = vector.broadcast %cst_78 : f32 to vector<16x1xf32>
      %206 = arith.addf %202, %205 : vector<16x1xf32>
      %207 = math.rsqrt %206 : vector<16x1xf32>
      %208 = vector.broadcast %207 : vector<16x1xf32> to vector<16x128xf32>
      %209 = arith.mulf %204, %208 : vector<16x128xf32>
      %210 = vector.broadcast %190 : vector<1x128xf32> to vector<16x128xf32>
      %211 = arith.mulf %209, %210 : vector<16x128xf32>
      %212 = vector.broadcast %191 : vector<1x128xf32> to vector<16x128xf32>
      %213 = arith.addf %211, %212 : vector<16x128xf32>
      %c0_79 = arith.constant 0 : index
      %c0_80 = arith.constant 0 : index
      %214 = vector.load %arg19[%c0_79, %c0_80] : memref<16x128xf32, #tpu.memory_space<vmem>>, vector<16x128xf32>
      tpu.vector_store %arg19[%c0_79, %c0_80], %213 {strides = array<i32>} : memref<16x128xf32, #tpu.memory_space<vmem>>, vector<16x128xf32>,
    } else {
    }
    %c0 = arith.constant 0 : index
    %c0_1 = arith.constant 0 : index
    %3 = vector.load %arg19[%c0, %c0_1] : memref<16x128xf32, #tpu.memory_space<vmem>>, vector<16x128xf32>
    %4 = arith.truncf %3 : vector<16x128xf32> to vector<16x128xbf16>
    %c0_2 = arith.constant 0 : index
    %c0_3 = arith.constant 0 : index
    %c0_4 = arith.constant 0 : index
    %5 = vector.load %arg5[%c0_2, %c0_3, %c0_4] : memref<1x128x384xbf16, #tpu.memory_space<vmem>>, vector<1x128x384xbf16>
    %6 = vector.shape_cast %5 : vector<1x128x384xbf16> to vector<128x384xbf16>
    %cst = arith.constant dense<0.000000e+00> : vector<16x384xf32>
    %7 = tpu.matmul %4, %6, %cst {dimension_numbers = #tpu.dot_dimension_numbers<[1], [0], [0], [1], [0, 0, 1, 1], [], []>} : vector<16x128xbf16>, vector<128x384xbf16>, vector<16x384xf32> -> vector<16x384xf32>
    %c0_5 = arith.constant 0 : index
    %c0_6 = arith.constant 0 : index
    %c0_7 = arith.constant 0 : index
    %8 = vector.load %arg6[%c0_5, %c0_6, %c0_7] : memref<1x1x384xf32, #tpu.memory_space<vmem>>, vector<1x1x384xf32>
    %9 = vector.shape_cast %8 : vector<1x1x384xf32> to vector<1x384xf32>
    %10 = vector.broadcast %9 : vector<1x384xf32> to vector<16x384xf32>
    %11 = arith.addf %7, %10 : vector<16x384xf32>
    %12 = vector.extract_strided_slice %11 {offsets = [0, 0], sizes = [16, 128], strides = [1, 1]} : vector<16x384xf32> to vector<16x128xf32>
    %13 = vector.extract_strided_slice %11 {offsets = [0, 128], sizes = [16, 128], strides = [1, 1]} : vector<16x384xf32> to vector<16x128xf32>
    %14 = vector.extract_strided_slice %11 {offsets = [0, 256], sizes = [16, 128], strides = [1, 1]} : vector<16x384xf32> to vector<16x128xf32>
    %15 = vector.extract_strided_slice %12 {offsets = [0, 0], sizes = [16, 32], strides = [1, 1]} : vector<16x128xf32> to vector<16x32xf32>
    %16 = vector.shape_cast %15 : vector<16x32xf32> to vector<2x1x8x32xf32>
    %17 = vector.extract_strided_slice %12 {offsets = [0, 32], sizes = [16, 32], strides = [1, 1]} : vector<16x128xf32> to vector<16x32xf32>
    %18 = vector.shape_cast %17 : vector<16x32xf32> to vector<2x1x8x32xf32>
    %19 = vector.extract_strided_slice %12 {offsets = [0, 64], sizes = [16, 32], strides = [1, 1]} : vector<16x128xf32> to vector<16x32xf32>
    %20 = vector.shape_cast %19 : vector<16x32xf32> to vector<2x1x8x32xf32>
    %21 = vector.extract_strided_slice %12 {offsets = [0, 96], sizes = [16, 32], strides = [1, 1]} : vector<16x128xf32> to vector<16x32xf32>
    %22 = vector.shape_cast %21 : vector<16x32xf32> to vector<2x1x8x32xf32>
    %23 = tpu.concatenate %16, %18, %20, %22 in 1 : vector<2x1x8x32xf32>, vector<2x1x8x32xf32>, vector<2x1x8x32xf32>, vector<2x1x8x32xf32> -> vector<2x4x8x32xf32>
    %24 = vector.shape_cast %23 : vector<2x4x8x32xf32> to vector<8x8x32xf32>
    %25 = arith.truncf %24 : vector<8x8x32xf32> to vector<8x8x32xbf16>
    %26 = vector.extract_strided_slice %13 {offsets = [0, 0], sizes = [16, 32], strides = [1, 1]} : vector<16x128xf32> to vector<16x32xf32>
    %27 = vector.shape_cast %26 : vector<16x32xf32> to vector<2x1x8x32xf32>
    %28 = vector.extract_strided_slice %13 {offsets = [0, 32], sizes = [16, 32], strides = [1, 1]} : vector<16x128xf32> to vector<16x32xf32>
    %29 = vector.shape_cast %28 : vector<16x32xf32> to vector<2x1x8x32xf32>
    %30 = vector.extract_strided_slice %13 {offsets = [0, 64], sizes = [16, 32], strides = [1, 1]} : vector<16x128xf32> to vector<16x32xf32>
    %31 = vector.shape_cast %30 : vector<16x32xf32> to vector<2x1x8x32xf32>
    %32 = vector.extract_strided_slice %13 {offsets = [0, 96], sizes = [16, 32], strides = [1, 1]} : vector<16x128xf32> to vector<16x32xf32>
    %33 = vector.shape_cast %32 : vector<16x32xf32> to vector<2x1x8x32xf32>
    %34 = tpu.concatenate %27, %29, %31, %33 in 1 : vector<2x1x8x32xf32>, vector<2x1x8x32xf32>, vector<2x1x8x32xf32>, vector<2x1x8x32xf32> -> vector<2x4x8x32xf32>
    %35 = vector.shape_cast %34 : vector<2x4x8x32xf32> to vector<8x8x32xf32>
    %36 = arith.truncf %35 : vector<8x8x32xf32> to vector<8x8x32xbf16>
    %37 = vector.extract_strided_slice %14 {offsets = [0, 0], sizes = [16, 32], strides = [1, 1]} : vector<16x128xf32> to vector<16x32xf32>
    %38 = vector.shape_cast %37 : vector<16x32xf32> to vector<2x1x8x32xf32>
    %39 = vector.extract_strided_slice %14 {offsets = [0, 32], sizes = [16, 32], strides = [1, 1]} : vector<16x128xf32> to vector<16x32xf32>
    %40 = vector.shape_cast %39 : vector<16x32xf32> to vector<2x1x8x32xf32>
    %41 = vector.extract_strided_slice %14 {offsets = [0, 64], sizes = [16, 32], strides = [1, 1]} : vector<16x128xf32> to vector<16x32xf32>
    %42 = vector.shape_cast %41 : vector<16x32xf32> to vector<2x1x8x32xf32>
    %43 = vector.extract_strided_slice %14 {offsets = [0, 96], sizes = [16, 32], strides = [1, 1]} : vector<16x128xf32> to vector<16x32xf32>
    %44 = vector.shape_cast %43 : vector<16x32xf32> to vector<2x1x8x32xf32>
    %45 = tpu.concatenate %38, %40, %42, %44 in 1 : vector<2x1x8x32xf32>, vector<2x1x8x32xf32>, vector<2x1x8x32xf32>, vector<2x1x8x32xf32> -> vector<2x4x8x32xf32>
    %46 = vector.shape_cast %45 : vector<2x4x8x32xf32> to vector<8x8x32xf32>
    %47 = arith.truncf %46 : vector<8x8x32xf32> to vector<8x8x32xbf16>
    %48 = tpu.iota {dimensions = array<i32: 2>} : vector<1x1x8xi32>
    %c0_8 = arith.constant 0 : index
    %49 = memref.load %arg1[%c0_8] : memref<2xi32, #tpu.memory_space<smem>>
    %50 = vector.broadcast %49 : i32 to vector<1x1x8xi32>
    %51 = arith.cmpi slt, %48, %50 : vector<1x1x8xi32>
    %cst_9 = arith.constant 0.000000e+00 : f32
    %cst_10 = arith.constant -1.000000e+09 : f32
    %52 = vector.broadcast %cst_9 : f32 to vector<1x1x8xf32>
    %53 = vector.broadcast %cst_10 : f32 to vector<1x1x8xf32>
    %54 = arith.select %51, %52, %53 : vector<1x1x8xi1>, vector<1x1x8xf32>
    %c1 = arith.constant 1 : index
    %55 = memref.load %arg1[%c1] : memref<2xi32, #tpu.memory_space<smem>>
    %56 = vector.broadcast %55 : i32 to vector<1x1x8xi32>
    %57 = arith.cmpi slt, %48, %56 : vector<1x1x8xi32>
    %cst_11 = arith.constant 0.000000e+00 : f32
    %cst_12 = arith.constant -1.000000e+09 : f32
    %58 = vector.broadcast %cst_11 : f32 to vector<1x1x8xf32>
    %59 = vector.broadcast %cst_12 : f32 to vector<1x1x8xf32>
    %60 = arith.select %57, %58, %59 : vector<1x1x8xi1>, vector<1x1x8xf32>
    %61 = tpu.concatenate %54, %60 in 0 : vector<1x1x8xf32>, vector<1x1x8xf32> -> vector<2x1x8xf32>
    %62 = vector.shape_cast %61 : vector<2x1x8xf32> to vector<2x1x1x8xf32>
    %63 = vector.shape_cast %62 : vector<2x1x1x8xf32> to vector<2x1x1x8xf32>
    %64 = vector.broadcast %63 : vector<2x1x1x8xf32> to vector<2x4x1x8xf32>
    %65 = vector.shape_cast %64 : vector<2x4x1x8xf32> to vector<8x1x8xf32>
    "tpu.trace_start"() <{level = 10 : i32, message = "gqd,gkd->gqk"}> : () -> ()
    %cst_13 = arith.constant dense<0.000000e+00> : vector<8x8x8xf32>
    %66 = tpu.matmul %25, %36, %cst_13 {dimension_numbers = #tpu.dot_dimension_numbers<[2], [2], [1], [1], [0, 0, 0, 1, 1, 1], [0], [0]>} : vector<8x8x32xbf16>, vector<8x8x32xbf16>, vector<8x8x8xf32> -> vector<8x8x8xf32>
    "tpu.trace_stop"() : () -> ()
    %cst_14 = arith.constant 0.176776692 : f32
    %67 = vector.broadcast %cst_14 : f32 to vector<8x8x8xf32>
    %68 = arith.mulf %66, %67 : vector<8x8x8xf32>
    %69 = vector.broadcast %65 : vector<8x1x8xf32> to vector<8x8x8xf32>
    %70 = arith.addf %68, %69 : vector<8x8x8xf32>
    %cst_15 = arith.constant dense<0xFF800000> : vector<8x8xf32>
    %71 = vector.multi_reduction <maximumf>, %70, %cst_15 [2] : vector<8x8x8xf32> to vector<8x8xf32>
    %72 = vector.shape_cast %71 : vector<8x8xf32> to vector<8x8x1xf32>
    %73 = vector.broadcast %72 : vector<8x8x1xf32> to vector<8x8x8xf32>
    %74 = arith.subf %70, %73 : vector<8x8x8xf32>
    %75 = math.exp %74 : vector<8x8x8xf32>
    %cst_16 = arith.constant dense<0.000000e+00> : vector<8x8xf32>
    %76 = vector.multi_reduction <add>, %75, %cst_16 [2] : vector<8x8x8xf32> to vector<8x8xf32>
    %77 = vector.shape_cast %76 : vector<8x8xf32> to vector<8x8x1xf32>
    %78 = tpu.reciprocal %77 {approx = true} : vector<8x8x1xf32> -> vector<8x8x1xf32>
    %79 = vector.broadcast %78 : vector<8x8x1xf32> to vector<8x8x8xf32>
    %80 = arith.mulf %75, %79 : vector<8x8x8xf32>
    %81 = arith.truncf %80 : vector<8x8x8xf32> to vector<8x8x8xbf16>
    "tpu.trace_start"() <{level = 10 : i32, message = "gqk,gkd->gqd"}> : () -> ()
    %cst_17 = arith.constant dense<0.000000e+00> : vector<8x8x32xf32>
    %82 = tpu.matmul %81, %47, %cst_17 {dimension_numbers = #tpu.dot_dimension_numbers<[2], [1], [1], [2], [0, 0, 0, 1, 1, 2], [0], [0]>} : vector<8x8x8xbf16>, vector<8x8x32xbf16>, vector<8x8x32xf32> -> vector<8x8x32xf32>
    "tpu.trace_stop"() : () -> ()
    %83 = vector.shape_cast %82 : vector<8x8x32xf32> to vector<2x4x8x32xf32>
    %84 = vector.extract_strided_slice %83 {offsets = [0, 0, 0, 0], sizes = [2, 1, 8, 32], strides = [1, 1, 1, 1]} : vector<2x4x8x32xf32> to vector<2x1x8x32xf32>
    %85 = vector.shape_cast %84 : vector<2x1x8x32xf32> to vector<2x8x32xf32>
    %86 = vector.extract_strided_slice %83 {offsets = [0, 1, 0, 0], sizes = [2, 1, 8, 32], strides = [1, 1, 1, 1]} : vector<2x4x8x32xf32> to vector<2x1x8x32xf32>
    %87 = vector.shape_cast %86 : vector<2x1x8x32xf32> to vector<2x8x32xf32>
    %88 = vector.extract_strided_slice %83 {offsets = [0, 2, 0, 0], sizes = [2, 1, 8, 32], strides = [1, 1, 1, 1]} : vector<2x4x8x32xf32> to vector<2x1x8x32xf32>
    %89 = vector.shape_cast %88 : vector<2x1x8x32xf32> to vector<2x8x32xf32>
    %90 = vector.extract_strided_slice %83 {offsets = [0, 3, 0, 0], sizes = [2, 1, 8, 32], strides = [1, 1, 1, 1]} : vector<2x4x8x32xf32> to vector<2x1x8x32xf32>
    %91 = vector.shape_cast %90 : vector<2x1x8x32xf32> to vector<2x8x32xf32>
    %92 = tpu.concatenate %85, %87, %89, %91 in 2 : vector<2x8x32xf32>, vector<2x8x32xf32>, vector<2x8x32xf32>, vector<2x8x32xf32> -> vector<2x8x128xf32>
    %93 = vector.shape_cast %92 : vector<2x8x128xf32> to vector<16x128xf32>
    %94 = arith.truncf %93 : vector<16x128xf32> to vector<16x128xbf16>
    %c0_18 = arith.constant 0 : index
    %c0_19 = arith.constant 0 : index
    %c0_20 = arith.constant 0 : index
    %95 = vector.load %arg7[%c0_18, %c0_19, %c0_20] : memref<1x128x128xbf16, #tpu.memory_space<vmem>>, vector<1x128x128xbf16>
    %96 = vector.shape_cast %95 : vector<1x128x128xbf16> to vector<128x128xbf16>
    %cst_21 = arith.constant dense<0.000000e+00> : vector<16x128xf32>
    %97 = tpu.matmul %94, %96, %cst_21 {dimension_numbers = #tpu.dot_dimension_numbers<[1], [0], [0], [1], [0, 0, 1, 1], [], []>} : vector<16x128xbf16>, vector<128x128xbf16>, vector<16x128xf32> -> vector<16x128xf32>
    %c0_22 = arith.constant 0 : index
    %c0_23 = arith.constant 0 : index
    %c0_24 = arith.constant 0 : index
    %98 = vector.load %arg8[%c0_22, %c0_23, %c0_24] : memref<1x1x128xf32, #tpu.memory_space<vmem>>, vector<1x1x128xf32>
    %99 = vector.shape_cast %98 : vector<1x1x128xf32> to vector<1x128xf32>
    %100 = vector.broadcast %99 : vector<1x128xf32> to vector<16x128xf32>
    %101 = arith.addf %97, %100 : vector<16x128xf32>
    %102 = arith.addf %101, %3 : vector<16x128xf32>
    %c0_25 = arith.constant 0 : index
    %c0_26 = arith.constant 0 : index
    %c0_27 = arith.constant 0 : index
    %103 = vector.load %arg9[%c0_25, %c0_26, %c0_27] : memref<1x1x128xf32, #tpu.memory_space<vmem>>, vector<1x1x128xf32>
    %104 = vector.shape_cast %103 : vector<1x1x128xf32> to vector<1x128xf32>
    %c0_28 = arith.constant 0 : index
    %c0_29 = arith.constant 0 : index
    %c0_30 = arith.constant 0 : index
    %105 = vector.load %arg10[%c0_28, %c0_29, %c0_30] : memref<1x1x128xf32, #tpu.memory_space<vmem>>, vector<1x1x128xf32>
    %106 = vector.shape_cast %105 : vector<1x1x128xf32> to vector<1x128xf32>
    %cst_31 = arith.constant dense<0.000000e+00> : vector<16xf32>
    %107 = vector.multi_reduction <add>, %102, %cst_31 [1] : vector<16x128xf32> to vector<16xf32>
    %108 = vector.shape_cast %107 : vector<16xf32> to vector<16x1xf32>
    %cst_32 = arith.constant 1.280000e+02 : f32
    %109 = vector.broadcast %cst_32 : f32 to vector<16x1xf32>
    %110 = arith.divf %108, %109 : vector<16x1xf32>
    %111 = vector.broadcast %110 : vector<16x1xf32> to vector<16x128xf32>
    %112 = arith.subf %102, %111 : vector<16x128xf32>
    %113 = arith.mulf %112, %112 : vector<16x128xf32>
    %cst_33 = arith.constant dense<0.000000e+00> : vector<16xf32>
    %114 = vector.multi_reduction <add>, %113, %cst_33 [1] : vector<16x128xf32> to vector<16xf32>
    %115 = vector.shape_cast %114 : vector<16xf32> to vector<16x1xf32>
    %cst_34 = arith.constant 1.280000e+02 : f32
    %116 = vector.broadcast %cst_34 : f32 to vector<16x1xf32>
    %117 = arith.divf %115, %116 : vector<16x1xf32>
    %118 = vector.broadcast %110 : vector<16x1xf32> to vector<16x128xf32>
    %119 = arith.subf %102, %118 : vector<16x128xf32>
    %cst_35 = arith.constant 9.99999974E-6 : f32
    %120 = vector.broadcast %cst_35 : f32 to vector<16x1xf32>
    %121 = arith.addf %117, %120 : vector<16x1xf32>
    %122 = math.rsqrt %121 : vector<16x1xf32>
    %123 = vector.broadcast %122 : vector<16x1xf32> to vector<16x128xf32>
    %124 = arith.mulf %119, %123 : vector<16x128xf32>
    %125 = vector.broadcast %104 : vector<1x128xf32> to vector<16x128xf32>
    %126 = arith.mulf %124, %125 : vector<16x128xf32>
    %127 = vector.broadcast %106 : vector<1x128xf32> to vector<16x128xf32>
    %128 = arith.addf %126, %127 : vector<16x128xf32>
    %129 = arith.truncf %128 : vector<16x128xf32> to vector<16x128xbf16>
    %c0_36 = arith.constant 0 : index
    %c0_37 = arith.constant 0 : index
    %c0_38 = arith.constant 0 : index
    %130 = vector.load %arg11[%c0_36, %c0_37, %c0_38] : memref<1x128x256xbf16, #tpu.memory_space<vmem>>, vector<1x128x256xbf16>
    %131 = vector.shape_cast %130 : vector<1x128x256xbf16> to vector<128x256xbf16>
    %cst_39 = arith.constant dense<0.000000e+00> : vector<16x256xf32>
    %132 = tpu.matmul %129, %131, %cst_39 {dimension_numbers = #tpu.dot_dimension_numbers<[1], [0], [0], [1], [0, 0, 1, 1], [], []>} : vector<16x128xbf16>, vector<128x256xbf16>, vector<16x256xf32> -> vector<16x256xf32>
    %c0_40 = arith.constant 0 : index
    %c0_41 = arith.constant 0 : index
    %c0_42 = arith.constant 0 : index
    %133 = vector.load %arg12[%c0_40, %c0_41, %c0_42] : memref<1x1x256xf32, #tpu.memory_space<vmem>>, vector<1x1x256xf32>
    %134 = vector.shape_cast %133 : vector<1x1x256xf32> to vector<1x256xf32>
    %135 = vector.broadcast %134 : vector<1x256xf32> to vector<16x256xf32>
    %136 = arith.addf %132, %135 : vector<16x256xf32>
    %cst_43 = arith.constant 5.000000e-01 : f32
    %137 = vector.broadcast %cst_43 : f32 to vector<16x256xf32>
    %138 = arith.mulf %137, %136 : vector<16x256xf32>
    %cst_44 = arith.constant 4.471500e-02 : f32
    %139 = vector.broadcast %cst_44 : f32 to vector<16x256xf32>
    %140 = arith.mulf %139, %136 : vector<16x256xf32>
    %141 = arith.mulf %140, %136 : vector<16x256xf32>
    %142 = arith.mulf %141, %136 : vector<16x256xf32>
    %143 = arith.addf %136, %142 : vector<16x256xf32>
    %cst_45 = arith.constant 0.797884583 : f32
    %144 = vector.broadcast %cst_45 : f32 to vector<16x256xf32>
    %145 = arith.mulf %144, %143 : vector<16x256xf32>
    %146 = math.tanh %145 : vector<16x256xf32>
    %cst_46 = arith.constant 1.000000e+00 : f32
    %147 = vector.broadcast %cst_46 : f32 to vector<16x256xf32>
    %148 = arith.addf %147, %146 : vector<16x256xf32>
    %149 = arith.mulf %138, %148 : vector<16x256xf32>
    %150 = arith.truncf %149 : vector<16x256xf32> to vector<16x256xbf16>
    %c0_47 = arith.constant 0 : index
    %c0_48 = arith.constant 0 : index
    %c0_49 = arith.constant 0 : index
    %151 = vector.load %arg13[%c0_47, %c0_48, %c0_49] : memref<1x256x128xbf16, #tpu.memory_space<vmem>>, vector<1x256x128xbf16>
    %152 = vector.shape_cast %151 : vector<1x256x128xbf16> to vector<256x128xbf16>
    %cst_50 = arith.constant dense<0.000000e+00> : vector<16x128xf32>
    %153 = tpu.matmul %150, %152, %cst_50 {dimension_numbers = #tpu.dot_dimension_numbers<[1], [0], [0], [1], [0, 0, 1, 1], [], []>} : vector<16x256xbf16>, vector<256x128xbf16>, vector<16x128xf32> -> vector<16x128xf32>
    %c0_51 = arith.constant 0 : index
    %c0_52 = arith.constant 0 : index
    %c0_53 = arith.constant 0 : index
    %154 = vector.load %arg14[%c0_51, %c0_52, %c0_53] : memref<1x1x128xf32, #tpu.memory_space<vmem>>, vector<1x1x128xf32>
    %155 = vector.shape_cast %154 : vector<1x1x128xf32> to vector<1x128xf32>
    %156 = vector.broadcast %155 : vector<1x128xf32> to vector<16x128xf32>
    %157 = arith.addf %153, %156 : vector<16x128xf32>
    %158 = arith.addf %157, %128 : vector<16x128xf32>
    %c0_54 = arith.constant 0 : index
    %c0_55 = arith.constant 0 : index
    %c0_56 = arith.constant 0 : index
    %159 = vector.load %arg15[%c0_54, %c0_55, %c0_56] : memref<1x1x128xf32, #tpu.memory_space<vmem>>, vector<1x1x128xf32>
    %160 = vector.shape_cast %159 : vector<1x1x128xf32> to vector<1x128xf32>
    %c0_57 = arith.constant 0 : index
    %c0_58 = arith.constant 0 : index
    %c0_59 = arith.constant 0 : index
    %161 = vector.load %arg16[%c0_57, %c0_58, %c0_59] : memref<1x1x128xf32, #tpu.memory_space<vmem>>, vector<1x1x128xf32>
    %162 = vector.shape_cast %161 : vector<1x1x128xf32> to vector<1x128xf32>
    %cst_60 = arith.constant dense<0.000000e+00> : vector<16xf32>
    %163 = vector.multi_reduction <add>, %158, %cst_60 [1] : vector<16x128xf32> to vector<16xf32>
    %164 = vector.shape_cast %163 : vector<16xf32> to vector<16x1xf32>
    %cst_61 = arith.constant 1.280000e+02 : f32
    %165 = vector.broadcast %cst_61 : f32 to vector<16x1xf32>
    %166 = arith.divf %164, %165 : vector<16x1xf32>
    %167 = vector.broadcast %166 : vector<16x1xf32> to vector<16x128xf32>
    %168 = arith.subf %158, %167 : vector<16x128xf32>
    %169 = arith.mulf %168, %168 : vector<16x128xf32>
    %cst_62 = arith.constant dense<0.000000e+00> : vector<16xf32>
    %170 = vector.multi_reduction <add>, %169, %cst_62 [1] : vector<16x128xf32> to vector<16xf32>
    %171 = vector.shape_cast %170 : vector<16xf32> to vector<16x1xf32>
    %cst_63 = arith.constant 1.280000e+02 : f32
    %172 = vector.broadcast %cst_63 : f32 to vector<16x1xf32>
    %173 = arith.divf %171, %172 : vector<16x1xf32>
    %174 = vector.broadcast %166 : vector<16x1xf32> to vector<16x128xf32>
    %175 = arith.subf %158, %174 : vector<16x128xf32>
    %cst_64 = arith.constant 9.99999974E-6 : f32
    %176 = vector.broadcast %cst_64 : f32 to vector<16x1xf32>
    %177 = arith.addf %173, %176 : vector<16x1xf32>
    %178 = math.rsqrt %177 : vector<16x1xf32>
    %179 = vector.broadcast %178 : vector<16x1xf32> to vector<16x128xf32>
    %180 = arith.mulf %175, %179 : vector<16x128xf32>
    %181 = vector.broadcast %160 : vector<1x128xf32> to vector<16x128xf32>
    %182 = arith.mulf %180, %181 : vector<16x128xf32>
    %183 = vector.broadcast %162 : vector<1x128xf32> to vector<16x128xf32>
    %184 = arith.addf %182, %183 : vector<16x128xf32>
    %c0_65 = arith.constant 0 : index
    %c0_66 = arith.constant 0 : index
    %185 = vector.load %arg19[%c0_65, %c0_66] : memref<16x128xf32, #tpu.memory_space<vmem>>, vector<16x128xf32>
    tpu.vector_store %arg19[%c0_65, %c0_66], %184 {strides = array<i32>} : memref<16x128xf32, #tpu.memory_space<vmem>>, vector<16x128xf32>,
    %c1_i32 = arith.constant 1 : i32
    %186 = arith.cmpi eq, %arg0, %c1_i32 : i32
    %187 = arith.extui %186 : i1 to i32
    %c0_i32_67 = arith.constant 0 : i32
    %188 = arith.cmpi ne, %187, %c0_i32_67 : i32
    scf.if %188 {
      %189 = vector.extract_strided_slice %184 {offsets = [0, 0], sizes = [1, 128], strides = [1, 1]} : vector<16x128xf32> to vector<1x128xf32>
      %190 = vector.extract_strided_slice %184 {offsets = [8, 0], sizes = [1, 128], strides = [1, 1]} : vector<16x128xf32> to vector<1x128xf32>
      %191 = tpu.concatenate %189, %190 in 0 : vector<1x128xf32>, vector<1x128xf32> -> vector<2x128xf32>
      %192 = arith.truncf %191 : vector<2x128xf32> to vector<2x128xbf16>
      %c0_68 = arith.constant 0 : index
      %c0_69 = arith.constant 0 : index
      %193 = vector.load %arg17[%c0_68, %c0_69] : memref<128x128xbf16, #tpu.memory_space<vmem>>, vector<128x128xbf16>
      %cst_70 = arith.constant dense<0.000000e+00> : vector<2x128xf32>
      %194 = tpu.matmul %192, %193, %cst_70 {dimension_numbers = #tpu.dot_dimension_numbers<[1], [0], [0], [1], [0, 0, 1, 1], [], []>} : vector<2x128xbf16>, vector<128x128xbf16>, vector<2x128xf32> -> vector<2x128xf32>
      %c0_71 = arith.constant 0 : index
      %c0_72 = arith.constant 0 : index
      %195 = vector.load %arg18[%c0_71, %c0_72] : memref<1x128xf32, #tpu.memory_space<vmem>>, vector<1x128xf32>
      %196 = vector.broadcast %195 : vector<1x128xf32> to vector<2x128xf32>
      %197 = arith.addf %194, %196 : vector<2x128xf32>
      %198 = math.tanh %197 : vector<2x128xf32>
      %c0_73 = arith.constant 0 : index
      %c0_74 = arith.constant 0 : index
      %199 = vector.load %arg20[%c0_73, %c0_74] : memref<2x128xf32, #tpu.memory_space<vmem>>, vector<2x128xf32>
      tpu.vector_store %arg20[%c0_73, %c0_74], %198 {strides = array<i32>} : memref<2x128xf32, #tpu.memory_space<vmem>>, vector<2x128xf32>,
    } else {
    }
    return
  }
  func.func @transform_0(%arg0: i32, %arg1: memref<2xi32, #tpu.memory_space<smem>>) -> (i32, i32) {
    %c0_i32 = arith.constant 0 : i32
    %c0_i32_0 = arith.constant 0 : i32
    %c0_i32_1 = arith.constant 0 : i32
    return %c0_i32, %c0_i32_0 : i32, i32
  }
  func.func @transform_1(%arg0: i32, %arg1: memref<2xi32, #tpu.memory_space<smem>>) -> (i32, i32) {
    %c0_i32 = arith.constant 0 : i32
    %c0_i32_0 = arith.constant 0 : i32
    %c0_i32_1 = arith.constant 0 : i32
    return %c0_i32, %c0_i32_0 : i32, i32
  }
  func.func @transform_2(%arg0: i32, %arg1: memref<2xi32, #tpu.memory_space<smem>>) -> (i32, i32) {
    %c0_i32 = arith.constant 0 : i32
    %c0_i32_0 = arith.constant 0 : i32
    %c0_i32_1 = arith.constant 0 : i32
    return %c0_i32, %c0_i32_0 : i32, i32
  }
  func.func @transform_3(%arg0: i32, %arg1: memref<2xi32, #tpu.memory_space<smem>>) -> (i32, i32, i32) {
    %c0_i32 = arith.constant 0 : i32
    %c0_i32_0 = arith.constant 0 : i32
    %c0_i32_1 = arith.constant 0 : i32
    return %arg0, %c0_i32, %c0_i32_0 : i32, i32, i32
  }
  func.func @transform_4(%arg0: i32, %arg1: memref<2xi32, #tpu.memory_space<smem>>) -> (i32, i32, i32) {
    %c0_i32 = arith.constant 0 : i32
    %c0_i32_0 = arith.constant 0 : i32
    %c0_i32_1 = arith.constant 0 : i32
    return %arg0, %c0_i32, %c0_i32_0 : i32, i32, i32
  }
  func.func @transform_5(%arg0: i32, %arg1: memref<2xi32, #tpu.memory_space<smem>>) -> (i32, i32, i32) {
    %c0_i32 = arith.constant 0 : i32
    %c0_i32_0 = arith.constant 0 : i32
    %c0_i32_1 = arith.constant 0 : i32
    return %arg0, %c0_i32, %c0_i32_0 : i32, i32, i32
  }
  func.func @transform_6(%arg0: i32, %arg1: memref<2xi32, #tpu.memory_space<smem>>) -> (i32, i32, i32) {
    %c0_i32 = arith.constant 0 : i32
    %c0_i32_0 = arith.constant 0 : i32
    %c0_i32_1 = arith.constant 0 : i32
    return %arg0, %c0_i32, %c0_i32_0 : i32, i32, i32
  }
  func.func @transform_7(%arg0: i32, %arg1: memref<2xi32, #tpu.memory_space<smem>>) -> (i32, i32, i32) {
    %c0_i32 = arith.constant 0 : i32
    %c0_i32_0 = arith.constant 0 : i32
    %c0_i32_1 = arith.constant 0 : i32
    return %arg0, %c0_i32, %c0_i32_0 : i32, i32, i32
  }
  func.func @transform_8(%arg0: i32, %arg1: memref<2xi32, #tpu.memory_space<smem>>) -> (i32, i32, i32) {
    %c0_i32 = arith.constant 0 : i32
    %c0_i32_0 = arith.constant 0 : i32
    %c0_i32_1 = arith.constant 0 : i32
    return %arg0, %c0_i32, %c0_i32_0 : i32, i32, i32
  }
  func.func @transform_9(%arg0: i32, %arg1: memref<2xi32, #tpu.memory_space<smem>>) -> (i32, i32, i32) {
    %c0_i32 = arith.constant 0 : i32
    %c0_i32_0 = arith.constant 0 : i32
    %c0_i32_1 = arith.constant 0 : i32
    return %arg0, %c0_i32, %c0_i32_0 : i32, i32, i32
  }
  func.func @transform_10(%arg0: i32, %arg1: memref<2xi32, #tpu.memory_space<smem>>) -> (i32, i32, i32) {
    %c0_i32 = arith.constant 0 : i32
    %c0_i32_0 = arith.constant 0 : i32
    %c0_i32_1 = arith.constant 0 : i32
    return %arg0, %c0_i32, %c0_i32_0 : i32, i32, i32
  }
  func.func @transform_11(%arg0: i32, %arg1: memref<2xi32, #tpu.memory_space<smem>>) -> (i32, i32, i32) {
    %c0_i32 = arith.constant 0 : i32
    %c0_i32_0 = arith.constant 0 : i32
    %c0_i32_1 = arith.constant 0 : i32
    return %arg0, %c0_i32, %c0_i32_0 : i32, i32, i32
  }
  func.func @transform_12(%arg0: i32, %arg1: memref<2xi32, #tpu.memory_space<smem>>) -> (i32, i32, i32) {
    %c0_i32 = arith.constant 0 : i32
    %c0_i32_0 = arith.constant 0 : i32
    %c0_i32_1 = arith.constant 0 : i32
    return %arg0, %c0_i32, %c0_i32_0 : i32, i32, i32
  }
  func.func @transform_13(%arg0: i32, %arg1: memref<2xi32, #tpu.memory_space<smem>>) -> (i32, i32, i32) {
    %c0_i32 = arith.constant 0 : i32
    %c0_i32_0 = arith.constant 0 : i32
    %c0_i32_1 = arith.constant 0 : i32
    return %arg0, %c0_i32, %c0_i32_0 : i32, i32, i32
  }
  func.func @transform_14(%arg0: i32, %arg1: memref<2xi32, #tpu.memory_space<smem>>) -> (i32, i32, i32) {
    %c0_i32 = arith.constant 0 : i32
    %c0_i32_0 = arith.constant 0 : i32
    %c0_i32_1 = arith.constant 0 : i32
    return %arg0, %c0_i32, %c0_i32_0 : i32, i32, i32
  }
  func.func @transform_15(%arg0: i32, %arg1: memref<2xi32, #tpu.memory_space<smem>>) -> (i32, i32) {
    %c0_i32 = arith.constant 0 : i32
    %c0_i32_0 = arith.constant 0 : i32
    %c0_i32_1 = arith.constant 0 : i32
    return %c0_i32, %c0_i32_0 : i32, i32
  }
  func.func @transform_16(%arg0: i32, %arg1: memref<2xi32, #tpu.memory_space<smem>>) -> (i32, i32) {
    %c0_i32 = arith.constant 0 : i32
    %c0_i32_0 = arith.constant 0 : i32
    %c0_i32_1 = arith.constant 0 : i32
    return %c0_i32, %c0_i32_0 : i32, i32
  }
  func.func @transform_17(%arg0: i32, %arg1: memref<2xi32, #tpu.memory_space<smem>>) -> (i32, i32) {
    %c0_i32 = arith.constant 0 : i32
    %c0_i32_0 = arith.constant 0 : i32
    %c0_i32_1 = arith.constant 0 : i32
    return %c0_i32, %c0_i32_0 : i32, i32
  }
  func.func @transform_18(%arg0: i32, %arg1: memref<2xi32, #tpu.memory_space<smem>>) -> (i32, i32) {
    %c0_i32 = arith.constant 0 : i32
    %c0_i32_0 = arith.constant 0 : i32
    %c0_i32_1 = arith.constant 0 : i32
    return %c0_i32, %c0_i32_0 : i32, i32
  }
}

</mosaic_0001>

<bundles_post_ra>
// kernel: roberta_lm_forward.1
= control target key start
LH: loop header
LB: loop body
LE: loop exit
PB: predicated region body
PF: predicated region fallthrough
CT: control target
= control target key end

     0   :  { %s4677_s0 = inlined_call_operand.vmem [shape: s32[2], index: 0, kind: input, shape index: {}]   ;;  %s4678_s1 = inlined_call_operand.vmem [shape: f32[16,128], index: 1, kind: input, shape index: {}]   ;;  %s4679_s2 = inlined_call_operand.vmem [shape: f32[1,128], index: 2, kind: input, shape index: {}]   ;;  %s4680_s3 = inlined_call_operand.vmem [shape: f32[1,128], index: 3, kind: input, shape index: {}]   ;;  %s4681_s4 = inlined_call_operand.vmem [shape: bf16[2,128,384], index: 4, kind: input, shape index: {}]   ;;  %s4682_s5 = inlined_call_operand.vmem [shape: f32[2,1,384], index: 5, kind: input, shape index: {}]   ;;  %s4683_s6 = inlined_call_operand.hbm [shape: bf16[2,128,128], index: 6, kind: input, shape index: {}]   ;;  %s4684_s7 = inlined_call_operand.vmem [shape: f32[2,1,128], index: 7, kind: input, shape index: {}]   ;;  %s4685_s8 = inlined_call_operand.vmem [shape: f32[2,1,128], index: 8, kind: input, shape index: {}]   ;;  %s4686_s9 = inlined_call_operand.vmem [shape: f32[2,1,128], index: 9, kind: input, shape index: {}]   ;;  %s4687_s10 = inlined_call_operand.hbm [shape: bf16[2,128,256], index: 10, kind: input, shape index: {}]   ;;  %s4688_s11 = inlined_call_operand.vmem [shape: f32[2,1,256], index: 11, kind: input, shape index: {}]   ;;  %s4689_s12 = inlined_call_operand.hbm [shape: bf16[2,256,128], index: 12, kind: input, shape index: {}]   ;;  %s4690_s13 = inlined_call_operand.vmem [shape: f32[2,1,128], index: 13, kind: input, shape index: {}]   ;;  %s4691_s14 = inlined_call_operand.vmem [shape: f32[2,1,128], index: 14, kind: input, shape index: {}]   ;;  %s4692_s15 = inlined_call_operand.vmem [shape: f32[2,1,128], index: 15, kind: input, shape index: {}]   ;;  %s4693_s16 = inlined_call_operand.hbm [shape: bf16[128,128], index: 16, kind: input, shape index: {}]   ;;  %s4694_s17 = inlined_call_operand.vmem [shape: f32[1,128], index: 17, kind: input, shape index: {}]   ;;  %s4695_s18 = inlined_call_operand.hbm [shape: f32[16,128], index: 18, kind: output, shape index: {0}]   ;;  %s4696_s19 = inlined_call_operand.hbm [shape: f32[2,128], index: 19, kind: output, shape index: {1}]  }
   0x1   :  { %4712 = sst [smem:[#allocation24_spill]] %s4677_s0 }
   0x2   :  { %4713 = sst [smem:[#allocation25_spill]] %s4678_s1  ;;  %s4729_s20 = sld [smem:[#allocation24_spill]] }
   0x3   :  { %4714 = sst [smem:[#allocation26_spill]] %s4679_s2 }
   0x4   :  { %4715 = sst [smem:[#allocation27_spill]] %s4680_s3 }
   0x5   :  { %4716 = sst [smem:[#allocation28_spill]] %s4681_s4 }
   0x6   :  { %4717 = sst [smem:[#allocation29_spill]] %s4682_s5 }
   0x7   :  { %4718 = sst [smem:[#allocation30_spill]] %s4683_s6 }
   0x8   :  { %4719 = sst [smem:[#allocation31_spill]] %s4686_s9 }
   0x9   :  { %4720 = sst [smem:[#allocation32_spill]] %s4687_s10 }
   0xa   :  { %4721 = sst [smem:[#allocation33_spill]] %s4688_s11 }
   0xb   :  { %4722 = sst [smem:[#allocation34_spill]] %s4689_s12 }
   0xc   :  { %4723 = sst [smem:[#allocation35_spill]] %s4690_s13  ;;  %s25_s13 = sshll.u32 %s4729_s20, 4  ;;  %s26_s13 = int_to_ptr.vmem [resolvable:$true] %s25_s13 }
   0xd   :  { %4724 = sst [smem:[#allocation36_spill]] %s4691_s14  ;;  %s3645_s21 = scalar_lea.vmem %s26_s13, 16 }
   0xe   :  { %4725 = sst [smem:[#allocation37_spill]] %s4692_s15  ;;  %p3646_p0 = scmp.ne.s32.totalorder %s26_s13, %s3645_s21 }
   0xf   :  { %4726 = sst [smem:[#allocation38_spill]] %s4694_s17  ;;  %p3650_p1 = scmp.lt.s32.totalorder %s26_s13, %s26_s13 }
  0x10   :  { %4727 = sst [smem:[#allocation39_spill]] %s4695_s18  ;;  %p3651_p2 = scmp.lt.s32.totalorder %s3645_s21, %s3645_s21 }
  0x11   :  { %4728 = sst [smem:[#allocation40_spill]] %s4696_s19 }
  0x12   :  { %p3652_p3 = por %p3651_p2, %p3650_p1 }
  0x14   :  { %p3653_p4 = pnand %p3652_p3, %p3646_p0 }
  0x16   :  { %3656 = shalt.err (!%p3653_p4)  }
  0x17   :  { %s3881_s1 = smov [#allocation3]  }
  0x18   :  { %28 = dma.vmem_to_smem %s26_s13, 16, %s3881_s1, [#allocation2] }
  0x19   :  { %3843 = dma.done.wait [#allocation2], 16 }
  0x1a   :  { %3844 = vsyncadd [#allocation2], 4294967280 }
  0x1b   :  { %30 = sfence }
  0x1c   :  { %31 = vsyncpa [#allocation5], 0 }
  0x1d   :  { %33 = vsyncpa [#allocation5 + $0x1], 0 }
  0x1e   :  { %34 = vsyncpa [#allocation8], 0 }
  0x1f   :  { %36 = vsyncpa [#allocation8 + $0x1], 0 }
  0x20   :  { %37 = vsyncpa [#allocation11], 0 }
  0x21   :  { %38 = vsyncpa [#allocation6], 0 }
  0x22   :  { %39 = vsyncpa [#allocation14], 0  ;;  %s4006_s22 = smov 0   ;;  %s4008_s2 = smov 0  }
  0x23   :  { %s4010_s23 = smov 0   ;;  %s4012_s24 = smov 0  }
  0x24 LB: > { %4730 = sst [smem:[#allocation21_spill]] %s3875_s23  ;;  %s4027_s13 = sadd.s32 1, %s3879_s24   ;;  %s3879_s24 = sphi %s4012_s24, %s4770_s24   ;;  %s3875_s23 = sphi %s4010_s23, %s4772_s23   ;;  %s3871_s2 = sphi %s4008_s2, %s4774_s2   ;;  %s3867_s22 = sphi %s4006_s22, %s4773_s22  }
  0x25   : > { %4731 = sst [smem:[#allocation22_spill]] %s4027_s13  ;;  %s167_s25 = sadd.s32 1, %s3875_s23 }
  0x26   : > { %s164_s3 = ssub.s32 %s3879_s24, %s4027_s13  ;;  %p174_p5 = scmp.ne.s32.totalorder %s3875_s23, %s3871_s2 }
  0x27   : > { %p165_p6 = scmp.eq.s32.totalorder %s164_s3, 0  ;;  %p175_p7 = scmp.eq.s32.totalorder %s3879_s24, 0 }
  0x28   : > { %p3431_p8 = scmp.lt.s32.totalorder %s3879_s24, 2  ;;  %s4040_s27 = sand.u32 1, %s3875_s23  }
  0x29   : > { %s4037_s26 = scalar_select %p165_p6, %s3875_s23, %s167_s25  }
  0x2a   : > { %p176_p9 = por %p175_p7, %p174_p5  ;;  %s601_s28 = sand.u32 1, %s3879_s24  }
  0x2b   : > { %4732 = sst [smem:[#allocation23_spill]] %s4037_s26  ;;  %s4701_s29 = sshll.u32 %s4040_s27, 7 }
  0x2c   : > { %p4044_p10 = pnand %p3431_p8, %p176_p9  ;;  %s4702_s30 = sshll.u32 %s3879_s24, 11 }
  0x2d   : > { %s4734_s10 = sld [smem:[#allocation32_spill]]  ;;  %s605_s25 = scalar_lea.vmem [#allocation7], %s4701_s29 }
  0x2e   : > { %s4733_s0 = scalar_select %p4044_p10, 1, 0 }
  0x2f   : > { %s612_s3 = sshll.u32 %s605_s25, 4  ;;  %s4060_s26 = scalar_lea.sflag [#allocation8], %s601_s28  ;;  %s4058_s3 = int_to_ptr.vmem [resolvable:$true] %s612_s3 }
  0x30   : > { %p4066_p12 = pneg %p4044_p10 }
  0x32   : > { %s4735_s13 = scalar_select %p4066_p12, 1, 0 }
  0x33   : > { %s4054_s1 = scalar_lea.hbm %s4734_s10, %s4702_s30  ;;  %s3662_s29 = scalar_lea.hbm %s4734_s10, 4096 }
  0x34   : > { %s3657_s23 = scalar_lea.hbm %s4054_s1, 2048  ;;  %p3663_p1 = scmp.lt.u32.totalorder %s4054_s1, %s4734_s10 }
  0x35   : > { %p3658_p11 = scmp.ne.s32.totalorder %s4054_s1, %s3657_s23  ;;  %p3664_p2 = scmp.lt.u32.totalorder %s3662_s29, %s3657_s23 }
  0x36   : > { %p3666_p4 = scmp.lt.u32.totalorder %s3657_s23, %s4054_s1 }
  0x37   : > { %p3660_p13 = pnand %p4066_p12, %p3658_p11  ;;  %p3665_p3 = por %p3664_p2, %p3663_p1 }
  0x39   : > { %p3661_p0 = pneg %p3660_p13  ;;  %p3667_p5 = por %p3666_p4, %p3665_p3 }
  0x3b   : > { %p3668_p6 = pnand %p3667_p5, %p3661_p0 }
  0x3d   : > { %3671 = shalt.err (!%p3668_p6)
}
  0x3e   : > { %s3672_s28 = scalar_lea.vmem %s4058_s3, 2048  ;;  %s3882_s20 = smov [#allocation7]  }
  0x3f   : > { %p3673_p7 = scmp.ne.s32.totalorder %s4058_s3, %s3672_s28  ;;  %s3677_s21 = sshll.u32 %s3882_s20, 4  ;;  %s3678_s21 = int_to_ptr.vmem [resolvable:$false] %s3677_s21 }
  0x40   : > { %s3679_s30 = scalar_lea.vmem %s3678_s21, 4096  ;;  %p3680_p11 = scmp.lt.s32.totalorder %s4058_s3, %s3678_s21 }
  0x41   : > { %p3675_p8 = pnand %p3673_p7, %p4066_p12  ;;  %p3681_p13 = scmp.lt.s32.totalorder %s3679_s30, %s3672_s28 }
  0x43   : > { %p3676_p9 = pneg %p3675_p8  ;;  %p3682_p1 = por %p3681_p13, %p3680_p11 }
  0x45   : > { %p3683_p2 = pnand %p3682_p1, %p3676_p9 }
  0x47   : > { %3686 = shalt.err (!%p3683_p2)
}
  0x48   : > { %s3883_s23 = smov 128   ;;  %s3884_s29 = smov 8  }
  0x49   : > { %3426 = dma.hbm_to_vmem [thread:$0]  (!%p4044_p10), %s4054_s1, 2048, %s4058_s3, %s4060_s26, %s3883_s23, %s3883_s23, %s3884_s29  }
  0x4a   : > { %s4736_s25 = sshll.u32 %s3879_s24, 11  ;;  %s4737_s12 = sld [smem:[#allocation34_spill]] }
  0x4b   : > { %s4738_s30 = sshll.u32 %s4040_s27, 7  ;;  %s4102_s18 = sadd.s32 4294967295, %s3879_s24  }
  0x4c   : > { %s633_s10 = scalar_lea.vmem [#allocation9], %s4738_s30  ;;  %p180_p0 = scmp.ne.s32.totalorder %s3871_s2, %s3867_s22 }
  0x4d   : > { %s640_s19 = sshll.u32 %s633_s10, 4  ;;  %p4705_p3 = scmp.eq.s32.totalorder %s4102_s18, 0  ;;  %s4099_s19 = int_to_ptr.vmem [resolvable:$true] %s640_s19 }
  0x4e   : > { %p3031_p4 = scmp.ge.s32.totalorder %s3879_s24, 1  ;;  %p509_p5 = scmp.lt.s32.totalorder %s3879_s24, 3 }
  0x4f   : > { %p4112_p7 = por %p4705_p3, %p180_p0  ;;  %s3885_s3 = smov [#allocation10]  }
  0x50   : > { %s4095_s21 = scalar_lea.hbm %s4737_s12, %s4736_s25  ;;  %p4116_p8 = pnand %p3031_p4, %p509_p5 }
  0x51   : > { %s4739_s1 = scalar_select %p4112_p7, 1, 0 }
  0x52   : > { %s4740_s10 = scalar_select %p4116_p8, 1, 0 }
  0x53   : > { %s530_s23 = sshll.u32 %s3885_s3, 4  ;;  %p3416_p9 = pneg %p4116_p8  ;;  %s4120_s23 = int_to_ptr.vmem [resolvable:$true] %s530_s23 }
  0x54   : > { %s3034_s22 = sshll.u32 %s4040_s27, 6  ;;  %s3156_s25 = sshll.u32 %s3879_s24, 10 }
  0x55   : > { %p4127_p11 = pnand %p3416_p9, %p4705_p3  ;;  %s566_s28 = scalar_lea.vmem [#allocation4], %s3034_s22 }
  0x56   : > { %s573_s20 = sshll.u32 %s566_s28, 4  ;;  %s4742_s6 = sld [smem:[#allocation30_spill]]  ;;  %s4161_s20 = int_to_ptr.vmem [resolvable:$true] %s573_s20 }
  0x57   : > { %s3687_s11 = scalar_lea.hbm %s4693_s16, 1024  ;;  %p3689_p1 = pneg %p4127_p11 }
  0x58   : > { %p3688_p13 = scmp.ne.s32.totalorder %s4693_s16, %s3687_s11  ;;  %p3694_p4 = scmp.lt.u32.totalorder %s3687_s11, %s4693_s16 }
  0x5a   : > { %p3690_p2 = pnand %p3689_p1, %p3688_p13 }
  0x5c   : > { %s4135_s15 = scalar_lea.hbm %s4742_s6, %s3156_s25  ;;  %p3691_p0 = pneg %p3690_p2 }
  0x5e   : > { %p3696_p5 = pnand %p3694_p4, %p3691_p0 }
  0x60   : > { %3699 = shalt.err (!%p3696_p5)
}
  0x61   : > { %s3700_s17 = scalar_lea.vmem %s4120_s23, 1024  ;;  %p3708_p7 = scmp.lt.s32.totalorder %s4120_s23, %s4120_s23 }
  0x62   : > { %p3701_p9 = scmp.ne.s32.totalorder %s4120_s23, %s3700_s17  ;;  %p3709_p8 = scmp.lt.s32.totalorder %s3700_s17, %s3700_s17 }
  0x64   : > { %p3703_p6 = pnand %p3701_p9, %p3689_p1  ;;  %p3710_p10 = por %p3709_p8, %p3708_p7 }
  0x66   : > { %p3704_p3 = pneg %p3703_p6 }
  0x68   : > { %p3711_p12 = pnand %p3710_p10, %p3704_p3 }
  0x6a   : > { %3714 = shalt.err (!%p3711_p12)
}
  0x6b   : > { %s3886_s5 = smov 64   ;;  %s3887_s9 = smov 4  }
  0x6c   : > { %3419 = dma.hbm_to_vmem [thread:$0]  (!%p4127_p11), %s4693_s16, 1024, %s4120_s23, [#allocation11], %s3886_s5, %s3886_s5, %s3887_s9  }
  0x6d   : > { %s563_s25 = scalar_lea.sflag [#allocation5], %s4040_s27  ;;  %s3715_s28 = scalar_lea.hbm %s4135_s15, 1024 }
  0x6e   : > { %p3716_p10 = scmp.ne.s32.totalorder %s4135_s15, %s3715_s28  ;;  %p4743_p12 = scmp.ne.s32.totalorder %s4735_s13, 0 }
  0x6f   : > { %s3720_s24 = scalar_lea.hbm %s4742_s6, 2048  ;;  %p3721_p7 = scmp.lt.u32.totalorder %s4135_s15, %s4742_s6 }
  0x70   : > { %p3718_p3 = pnand %p3716_p10, %p4743_p12  ;;  %p3722_p8 = scmp.lt.u32.totalorder %s3720_s24, %s3715_s28 }
  0x71   : > { %p3724_p1 = scmp.lt.u32.totalorder %s3715_s28, %s4135_s15 }
  0x72   : > { %p3719_p6 = pneg %p3718_p3  ;;  %p3723_p13 = por %p3722_p8, %p3721_p7 }
  0x74   : > { %p3725_p11 = por %p3724_p1, %p3723_p13 }
  0x76   : > { %p3726_p2 = pnand %p3725_p11, %p3719_p6 }
  0x78   : > { %3729 = shalt.err (!%p3726_p2)
}
  0x79   : > { %s3730_s23 = scalar_lea.vmem %s4161_s20, 1024  ;;  %s3888_s17 = smov [#allocation4]  }
  0x7a   : > { %p3731_p0 = scmp.ne.s32.totalorder %s4161_s20, %s3730_s23  ;;  %s3735_s11 = sshll.u32 %s3888_s17, 4  ;;  %s3736_s11 = int_to_ptr.vmem [resolvable:$false] %s3735_s11 }
  0x7b   : > { %s3737_s14 = scalar_lea.vmem %s3736_s11, 2048  ;;  %p3738_p9 = scmp.lt.s32.totalorder %s4161_s20, %s3736_s11 }
  0x7c   : > { %p3733_p4 = pnand %p3731_p0, %p4743_p12  ;;  %p3739_p10 = scmp.lt.s32.totalorder %s3737_s14, %s3730_s23 }
  0x7e   : > { %p3734_p5 = pneg %p3733_p4  ;;  %p3740_p3 = por %p3739_p10, %p3738_p9 }
  0x80   : > { %p3741_p7 = pnand %p3740_p3, %p3734_p5 }
  0x82   : > { %3744 = shalt.err (!%p3741_p7)
}
  0x83   : > { %p4744_p6 = scmp.ne.s32.totalorder %s4733_s0, 0  ;;  %s3745_s28 = scalar_lea.hbm %s4095_s21, 2048 }
  0x84   : > { %p3746_p8 = scmp.ne.s32.totalorder %s4095_s21, %s3745_s28  ;;  %s3750_s24 = scalar_lea.hbm %s4737_s12, 4096 }
  0x85   : > { %3423 = dma.hbm_to_vmem [thread:$0]  (!%p4744_p6), %s4135_s15, 1024, %s4161_s20, %s563_s25, %s3886_s5, %s3886_s5, %s3887_s9  }
  0x86   : > { %p3748_p13 = pnand %p3746_p8, %p4743_p12  ;;  %p3751_p11 = scmp.lt.u32.totalorder %s4095_s21, %s4737_s12 }
  0x87   : > { %p3752_p2 = scmp.lt.u32.totalorder %s3750_s24, %s3745_s28  ;;  %p3754_p4 = scmp.lt.u32.totalorder %s3745_s28, %s4095_s21 }
  0x88   : > { %p3749_p1 = pneg %p3748_p13 }
  0x89   : > { %p3753_p0 = por %p3752_p2, %p3751_p11 }
  0x8b   : > { %p3755_p5 = por %p3754_p4, %p3753_p0 }
  0x8d   : > { %p3756_p9 = pnand %p3755_p5, %p3749_p1 }
  0x8f   : > { %3759 = shalt.err (!%p3756_p9)
}
  0x90   : > { %s3760_s15 = scalar_lea.vmem %s4099_s19, 2048  ;;  %s3889_s27 = smov [#allocation9]  }
  0x91   : > { %p3761_p10 = scmp.ne.s32.totalorder %s4099_s19, %s3760_s15  ;;  %s3765_s20 = sshll.u32 %s3889_s27, 4  ;;  %s3766_s20 = int_to_ptr.vmem [resolvable:$false] %s3765_s20 }
  0x92   : > { %s3767_s25 = scalar_lea.vmem %s3766_s20, 4096  ;;  %p3768_p8 = scmp.lt.s32.totalorder %s4099_s19, %s3766_s20 }
  0x93   : > { %p3763_p3 = pnand %p3761_p10, %p4743_p12  ;;  %p3769_p13 = scmp.lt.s32.totalorder %s3767_s25, %s3760_s15 }
  0x95   : > { %p3764_p7 = pneg %p3763_p3  ;;  %p3770_p11 = por %p3769_p13, %p3768_p8 }
  0x97   : > { %p3771_p2 = pnand %p3770_p11, %p3764_p7 }
  0x99   : > { %3774 = shalt.err (!%p3771_p2)
}
  0x9a   : > { %3429 = dma.hbm_to_vmem [thread:$0]  (!%p4744_p6), %s4095_s21, 2048, %s4099_s19, %s4060_s26, %s3886_s5, %s3886_s5, %s3887_s9  }
  0x9b   : > { %p4745_p12 = scmp.ne.s32.totalorder %s4740_s10, 0 }
  0x9c   : > { %s672_s13 = sand.u32 (!%p4745_p12), 1, %s3871_s2   ;;  %p4746_p1 = scmp.ne.s32.totalorder (!%p4745_p12), %s4739_s1, 0 }
  0x9d   : > { %670 = sbr.rel (%p4745_p12) target bundleno = 3388 (0xd3c), region = 88  ;;  %s3044_s23 = sshll.u32 (!%p4745_p12), %s672_s13, 6 }
  0x9e   : > { %s673_s17 = scalar_lea.sflag (!%p4745_p12), [#allocation5], %s672_s13  ;;  %s4218_s11 = scalar_lea.vmem (!%p4745_p12), [#allocation4], %s3044_s23 }
  0xa4   : > { %3846 = dma.done.wait (%p4746_p1), %s673_s17, 1024  }
  0xa5   : > { %3848 = vsyncadd (%p4746_p1), %s673_s17, 4294966272  ;;  %s681_s0 = sand.u32 1, %s4102_s18   ;;  %s3045_s14 = sshll.u32 %s672_s13, 7 }
  0xa6   : > { %s682_s19 = scalar_lea.sflag [#allocation8], %s681_s0  ;;  %s4225_s26 = scalar_lea.vmem [#allocation7], %s3045_s14 }
  0xa7   : > { %3850 = dma.done.wait (%p4746_p1), %s682_s19, 4096  }
  0xa8   : > { %3852 = vsyncadd (%p4746_p1), %s682_s19, 4294963200  ;;  %s4231_s21 = scalar_lea.vmem [#allocation9], %s3045_s14  ;;  %p4747_p6 = scmp.eq.s32.totalorder %s4102_s18, 0 }
  0xaa   : > { %3854 = dma.done.wait (%p4747_p6), [#allocation11], 1024   ;;  %p4748_p0 = pmov %p4747_p6 }
  0xab   : > { %p787_p4 = scmp.lt.s32.totalorder %s4102_s18, 1  ;;  %s4749_s4 = sld [smem:[#allocation28_spill]] }
  0xac   : > { %3856 = vsyncadd (%p4748_p0), [#allocation11], 4294966272  ;;  %s4751_s14 = sld [smem:[#allocation29_spill]]  ;;  %s4752_s6 = sld [smem:[#allocation33_spill]] }
  0xad   : > { %s4239_s10 = scalar_select %p787_p4, %s4102_s18, 1 }
  0xae   : > { %s4753_s22 = sld [smem:[#allocation35_spill]]  ;;  %s4754_s12 = sld [smem:[#allocation36_spill]] }
  0xaf   : > { %s3396_s1 = smul.u32 192, %s4239_s10  ;;  %s3049_s5 = sshll.u32 %s4239_s10, 1 }
  0xb0   : > { %s3397_s30 = smul.u32 3, %s4239_s10  ;;  %s4755_s23 = sld [smem:[#allocation37_spill]] }
  0xb1   : > { %s4254_s27 = scalar_lea.vmem %s4749_s4, %s3396_s1  ;;  %p4756_p5 = scmp.ne.s32.totalorder %s4102_s18, 0 }
  0xb2   : > { %s4263_s19 = scalar_lea.vmem %s4751_s14, %s3397_s30  ;;  %s4269_s3 = scalar_lea.vmem %s4752_s6, %s3049_s5 }
  0xb3   : > { %822 = sbr.rel (%p4756_p5) target bundleno = 502 (0x1f6), region = 108  ;;  %s4757_s28 = sld [smem:[#allocation25_spill]] (!%p4756_p5) }
  0xb4   : > { %s811_s1 = scalar_lea.vmem %s4753_s22, %s4239_s10  ;;  %s814_s20 = scalar_lea.vmem %s4754_s12, %s4239_s10 }
  0xb5   : > { %s4758_s29 = sld [smem:[#allocation26_spill]] (!%p4756_p5)  ;;  %s4759_s9 = sld [smem:[#allocation27_spill]] (!%p4756_p5) }
  0xb6   : > { %s817_s17 = scalar_lea.vmem %s4755_s23, %s4239_s10 }
  0xb9   : > { %v823_v0 = vld [vmem:[%s4757_s28] sm:$0xff] (!%p4756_p5)  ;;  %v824_v1 = vld [vmem:[%s4757_s28 + $0x8] sm:$0xff] (!%p4756_p5) }
  0xba   : > { %827 = vadd.xlane.f32.xlu0 %v823_v0 }
  0xbb   : > { %v3051_v17 = vld [vmem:[%s4758_s29] ss:$0 sm:$0xff] }
  0xbc   : > { %v3052_v19 = vld [vmem:[%s4759_s9] ss:$0 sm:$0xff] }
  0xbe   : > { %829 = vadd.xlane.f32.xlu0 %v824_v1 }
 0x147   : > { %v828_v2 = vpop.xlane.xlu0 %827 }
 0x148   : > { %v832_v3 = vmul.f32 0.0078125, %v828_v2 }
 0x14a   : > { %v834_v4 = vsub.f32 %v823_v0, %v832_v3 }
 0x14b   : > { %v830_v5 = vpop.xlane.xlu0 %829 }
 0x14c   : > { %v833_v6 = vmul.f32 0.0078125, %v830_v5  ;;  %v836_v7 = vmul.f32 %v834_v4, %v834_v4 }
 0x14e   : > { %v835_v8 = vsub.f32 %v824_v1, %v833_v6  ;;  %838 = vadd.xlane.f32.xlu1 %v836_v7 }
 0x150   : > { %v837_v9 = vmul.f32 %v835_v8, %v835_v8 }
 0x152   : > { %840 = vadd.xlane.f32.xlu1 %v837_v9 }
 0x1db   : > { %v839_v10 = vpop.xlane.xlu1 %838 }
 0x1dc   : > { %v842_v11 = vmul.f32 0.0078125, %v839_v10 }
 0x1de   : > { %v844_v12 = vadd.f32 1e-05, %v842_v11 }
 0x1df   : > { %v841_v13 = vpop.xlane.xlu1 %840 }
 0x1e0   : > { %3488 = vrsqrt.f32 %v844_v12  ;;  %v843_v14 = vmul.f32 0.0078125, %v841_v13 }
 0x1e2   : > { %v845_v15 = vadd.f32 1e-05, %v843_v14 }
 0x1e4   : > { %3490 = vrsqrt.f32 %v845_v15 }
 0x1ea   : > { %v3489_v16 = vpop.eup %3488 }
 0x1eb   : > { %v848_v18 = vmul.f32 %v3489_v16, %v834_v4 }
 0x1ed   : > { %v856_v20 = vmul.f32 %v3051_v17, %v848_v18 }
 0x1ee   : > { %v3491_v21 = vpop.eup %3490 }
 0x1ef   : > { %v864_v22 = vadd.f32 %v3052_v19, %v856_v20  ;;  %v849_v23 = vmul.f32 %v3491_v21, %v835_v8 }
 0x1f1   : > { %866 = vst [vmem:[#allocation12] sm:$0xff] %v864_v22  ;;  %v857_v24 = vmul.f32 %v3051_v17, %v849_v23 }
 0x1f3   : > { %v865_v25 = vadd.f32 %v3052_v19, %v857_v24 }
 0x1f5   : > { %867 = vst [vmem:[#allocation12 + $0x8] sm:$0xff] %v865_v25 }
 0x1f6 PF: > { %v3507_v26 = vld [vmem:[%s4254_s27 + $0x4] ss:$12 sps:$4 sm:$0xff]   ;;  %v3509_v27 = vld [vmem:[%s4254_s27] ss:$12 sps:$4 sm:$0xff]   ;;  %v3890_v28 = vmov 0   ;;  %v3891_v29 = vmov 0.0   ;;  %v905_v55 = vlaneseq  ;;  %s4760_s13 = scalar_lea.vmem %s4684_s7, %s4239_s10  ;;  %s4761_s6 = scalar_lea.vmem %s4685_s8, %s4239_s10 }
 0x1f7   : > { %1080 = vmatprep.mubr.bf16.mxu0 %v3890_v28  ;;  %3240 = vmatprep.subr.bf16.mxu1 %v3891_v29  ;;  %v3510_v30 = vld [vmem:[%s4254_s27 + $0x1c] ss:$12 sps:$4 sm:$0xff]   ;;  %v3512_v31 = vld [vmem:[%s4254_s27 + $0x18] ss:$12 sps:$4 sm:$0xff]   ;;  %v3513_v32 = vld [vmem:[%s4254_s27 + $0x34] ss:$12 sps:$4 sm:$0xff]  }
 0x1f8   : > { %1048 = vmatprep.subr.bf16.mxu0 %v3507_v26  ;;  %v3515_v33 = vld [vmem:[%s4254_s27 + $0x30] ss:$12 sps:$4 sm:$0xff]   ;;  %v3516_v34 = vld [vmem:[%s4254_s27 + $0x4c] ss:$12 sps:$4 sm:$0xff]   ;;  %v3518_v35 = vld [vmem:[%s4254_s27 + $0x48] ss:$12 sps:$4 sm:$0xff]  }
 0x1f9   : > { %1049 = vmatpush1.bf16.msra.mxu0 %v3509_v27  ;;  %v3519_v36 = vld [vmem:[%s4254_s27 + $0x64] ss:$12 sps:$4 sm:$0xff]   ;;  %v3531_v37 = vld [vmem:[%s4254_s27 + $0x8] ss:$12 sps:$4 sm:$0xff]   ;;  %v3532_v38 = vld [vmem:[%s4254_s27 + $0x20] ss:$12 sps:$4 sm:$0xff]  }
 0x1fa   : > { %1050 = vmatprep.subr.bf16.mxu0 %v3510_v30  ;;  %3241 = vmatpush3.bf16.msra.mxu1 %v3531_v37  ;;  %v3521_v39 = vld [vmem:[%s4254_s27 + $0x60] ss:$12 sps:$4 sm:$0xff]   ;;  %v3522_v40 = vld [vmem:[%s4254_s27 + $0x7c] ss:$12 sps:$4 sm:$0xff]   ;;  %v3533_v41 = vld [vmem:[%s4254_s27 + $0x38] ss:$12 sps:$4 sm:$0xff]  }
 0x1fb   : > { %3242 = vmatprep.subr.bf16.mxu1 %v3891_v29  ;;  %v3524_v42 = vld [vmem:[%s4254_s27 + $0x78] ss:$12 sps:$4 sm:$0xff]   ;;  %v3525_v43 = vld [vmem:[%s4254_s27 + $0x94] ss:$12 sps:$4 sm:$0xff]   ;;  %v3534_v44 = vld [vmem:[%s4254_s27 + $0x50] ss:$12 sps:$4 sm:$0xff]  }
 0x1fc   : > { %v3527_v45 = vld [vmem:[%s4254_s27 + $0x90] ss:$12 sps:$4 sm:$0xff]   ;;  %v3528_v46 = vld [vmem:[%s4254_s27 + $0xac] ss:$12 sps:$4 sm:$0xff]   ;;  %v3535_v47 = vld [vmem:[%s4254_s27 + $0x68] ss:$12 sps:$4 sm:$0xff]  }
 0x1fd   : > { %1051 = vmatpush1.bf16.msra.mxu0 %v3512_v31  ;;  %v3530_v48 = vld [vmem:[%s4254_s27 + $0xa8] ss:$12 sps:$4 sm:$0xff]   ;;  %v4323_v49 = vld [vmem:[#allocation12] sm:$0xff]  ;;  %v3538_v54 = vld [vmem:[%s4254_s27 + $0xb0] ss:$12 sps:$4 sm:$0xff]   ;;  %vm3892_vm0 = vmmov 0  }
 0x1fe   : > { %1052 = vmatprep.subr.bf16.mxu0 %v3513_v32  ;;  %3243 = vmatpush3.bf16.msra.mxu1 %v3532_v38  ;;  %v4325_v50 = vld [vmem:[#allocation12 + $0x8] sm:$0xff]  ;;  %v3537_v53 = vld [vmem:[%s4254_s27 + $0x98] ss:$12 sps:$4 sm:$0xff]   ;;  %v4344_v56 = vshrl.u32 %v905_v55, 7  ;;  %v903_v58 = vld [vmem:[%s4263_s19] sm:$0x7] }
 0x1ff   : > { %3244 = vmatprep.subr.bf16.mxu1 %v3891_v29  ;;  %v3536_v51 = vld [vmem:[%s4254_s27 + $0x80] ss:$12 sps:$4 sm:$0xff]   ;;  %v870_v52 = vpack.c.bf16 %v4325_v50, %v4323_v49  ;;  %3256 = vmatprep.mubr.msk.bf16.mxu1 %vm3892_vm0, %v3891_v29  ;;  %vm1226_vm1 = vcmask 261120   ;;  %s3893_s27 = smov 64   ;;  %s3894_s24 = smov 96   ;;  %v4379_v19 = vand.u32 127, %v905_v55 }
 0x200   : > { %v911_v57 = vsub.s32 1, %v4344_v56  ;;  %v4349_v59 = vsub.s32 0, %v4344_v56  ;;  %s3895_s19 = smov 32   ;;  %v915_v12 = vsub.s32 2, %v4344_v56  ;;  %s3077_s22 = sld [smem:[#allocation3 + $0x1]]  ;;  %vm1719_vm3 = vcmask 1043456  }
 0x201   : > { %1053 = vmatpush1.bf16.msra.mxu0 %v3515_v33  ;;  %v3896_v21 = vmov -1e+09   ;;  %s1218_s15 = sld [smem:[#allocation3]]  ;;  %vm1619_vm5 = vcmask 64512   ;;  %vm2111_vm6 = vcmask 523264   ;;  %vm2114_vm7 = vcmask 785408  }
 0x202   : > { %1054 = vmatprep.subr.bf16.mxu0 %v3516_v34  ;;  %3245 = vmatpush3.bf16.msra.mxu1 %v3533_v41  ;;  %v912_v60 = vrot.slane %v903_v58, %v911_v57  ;;  %v908_v63 = vrot.slane %v903_v58, %v4349_v59  ;;  %v916_v13 = vrot.slane %v903_v58, %v915_v12  ;;  %s4762_s4 = sld [smem:[#allocation31_spill]]  ;;  %p3140_p9 = scmp.ne.s32.totalorder %s4102_s18, 1 }
 0x203   : > { %3246 = vmatprep.subr.bf16.mxu1 %v3891_v29  ;;  %vm3898_vm8 = vmmov (!%p3140_p9), 0   ;;  %vm2690_vm9 = vcmask (!%p3140_p9), 1040384  }
 0x205   : > { %1055 = vmatpush1.bf16.msra.mxu0 %v3518_v35 }
 0x206   : > { %1056 = vmatprep.subr.bf16.mxu0 %v3519_v36  ;;  %3247 = vmatpush3.bf16.msra.mxu1 %v3534_v44  ;;  %v1223_v20 = vstv %s3077_s22 }
 0x207   : > { %3248 = vmatprep.subr.bf16.mxu1 %v3891_v29  ;;  %vm1224_vm2 = vcmp.lt.s32.totalorder %v4379_v19, %v1223_v20 }
 0x208   : > { %v4383_v22 = vsel %vm1224_vm2, 0.0, %v3896_v21  ;;  %s4763_s12 = scalar_lea.vmem %s4762_s4, %s4239_s10 }
 0x209   : > { %1057 = vmatpush1.bf16.msra.mxu0 %v3521_v39 }
 0x20a   : > { %1058 = vmatprep.subr.bf16.mxu0 %v3522_v40  ;;  %3249 = vmatpush3.bf16.msra.mxu1 %v3535_v47 }
 0x20b   : > { %3250 = vmatprep.subr.bf16.mxu1 %v3891_v29 }
 0x20d   : > { %1059 = vmatpush1.bf16.msra.mxu0 %v3524_v42 }
 0x20e   : > { %1060 = vmatprep.subr.bf16.mxu0 %v3525_v43  ;;  %3251 = vmatpush3.bf16.msra.mxu1 %v3536_v51 }
 0x20f   : > { %3252 = vmatprep.subr.bf16.mxu1 %v3891_v29 }
 0x211   : > { %1061 = vmatpush1.bf16.msra.mxu0 %v3527_v45 }
 0x212   : > { %1062 = vmatprep.subr.bf16.mxu0 %v3528_v46  ;;  %3253 = vmatpush3.bf16.msra.mxu1 %v3537_v53 }
 0x213   : > { %3254 = vmatprep.subr.bf16.mxu1 %v3891_v29 }
 0x215   : > { %1063 = vmatpush1.bf16.msra.mxu0 %v3530_v48 }
 0x216   : > { %3284 = vmatprep.subr.bf16.mxu0 %v3891_v29  ;;  %3255 = vmatpush3.bf16.msra.mxu1 %v3538_v54 }
 0x217   : > { %3260 = vmatprep.subr.bf16.mxu1 %v3891_v29 }
 0x218   : > { %1081 = vmatmul.mubr.bf16.vlgmr.msra.gmra.mrb[0].mxu0 %v870_v52 }
 0x219   : > { %3286 = vmatprep.mubr.msk.bf16.mxu0 %vm3892_vm0, %v3891_v29  ;;  %3257 = vmatmul.mubr.bf16.vlgmr.msra.gmra.mrb[0].mxu1 %v870_v52 }
 0x21a   : > { %3262 = vmatprep.mubr.msk.bf16.mxu1 %vm3892_vm0, %v3891_v29 }
 0x2eb   : > { %v1082_v61 = vpop.f32.mrb[0].mxu0 }
 0x2ec   : > { %v1084_v62 = vpop.f32.mrb[1].mxu0  ;;  %v1083_v5 = vadd.f32 %v1082_v61, %v908_v63  ;;  %v1125_v14 = vpop.f32.mrb[0].mxu1 }
 0x2ed   : > { %v1085_v0 = vadd.f32 %v1084_v62, %v912_v60  ;;  %v1086_v1 = vpop.f32.mrb[2].mxu0  ;;  %v3258_v15 = vpop.f32.mrb[1].mxu1  ;;  %v4392_v39 = vadd.f32 %v1125_v14, %v916_v13 }
 0x2ee   : > { %v1088_v2 = vpop.f32.mrb[3].mxu0  ;;  %v1087_v9 = vadd.f32 %v1086_v1, %v908_v63  ;;  %v1152_v10 = vpack.c.bf16 %v1083_v5, %v1083_v5  ;;  %v1128_v16 = vpop.f32.mrb[2].mxu1  ;;  %v1219_v63 = vstv %s1218_s15 }
 0x2ef   : > { %v1089_v3 = vadd.f32 %v1088_v2, %v912_v60  ;;  %1168 = vrot.lane.b32.xlu1 %v1085_v0, %s3893_s27  ;;  %1162 = vrot.lane.b32.xlu0 %v1085_v0, %s3894_s24  ;;  %v1180_v4 = vpack.c.bf16 %v1085_v0, %v1085_v0  ;;  %v4377_v17 = vadd.f32 %v1128_v16, %v916_v13  ;;  %v3259_v18 = vpop.f32.mrb[3].mxu1 }
 0x2f0   : > { %v1156_v11 = vpack.c.bf16 %v1087_v9, %v1087_v9  ;;  %v1208_v44 = vpack.c.bf16 %v4392_v39, %v4392_v39  ;;  %vm1220_vm4 = vcmp.lt.s32.totalorder %v4379_v19, %v1219_v63 }
 0x2f1   : > { %v1231_v6 = vsel %vm1226_vm1, %v1180_v4, 0  ;;  %v1184_v7 = vpack.c.bf16 %v1089_v3, %v1089_v3 }
 0x2f2   : > { %3261 = vmatpush3.bf16.xpose.msra.mxu1 %v1231_v6  ;;  %v1721_v48 = vsel %vm1719_vm3, %v1208_v44, 0 }
 0x2f3   : > { %1140 = vrot.lane.b32.xlu1 %v1083_v5, %s3893_s27  ;;  %1134 = vrot.lane.b32.xlu0 %v1083_v5, %s3894_s24  ;;  %v1415_v8 = vsel %vm1226_vm1, %v1184_v7, 0 }
 0x2f4   : > { %3285 = vmatpush3.bf16.xpose.msra.mxu0 %v1415_v8  ;;  %3266 = vmatprep.subr.bf16.mxu1 %v3891_v29 }
 0x2f5   : > { %3296 = vmatprep.subr.bf16.mxu0 %v3891_v29 }
 0x2f7   : > { %1146 = vrot.lane.b32.xlu1 %v1083_v5, %s3895_s19  ;;  %1174 = vrot.lane.b32.xlu0 %v1085_v0, %s3895_s19  ;;  %v1221_v0 = vsel %vm1220_vm4, 0.0, %v3896_v21  ;;  %v1610_v5 = vrot.slane %v4383_v22, %v4349_v59 }
 0x2f8   : > { %v1606_v1 = vrot.slane %v1221_v0, %v4349_v59 }
 0x2f9   : > { %3263 = vmatmul.mubr.msk.bf16.vlgmr.msra.gmra.mrb[4].mxu1 %vm1226_vm1, %v1152_v10 }
 0x2fa   : > { %3268 = vmatprep.mubr.msk.bf16.mxu1 %vm3892_vm0, %v3891_v29 }
 0x2fb   : > { %3287 = vmatmul.mubr.msk.bf16.vlgmr.msra.gmra.mrb[4].mxu0 %vm1226_vm1, %v1156_v11  ;;  %1170 = vrot.lane.b32.xlu1 %v1089_v3, %s3893_s27 }
 0x2fc   : > { %1164 = vrot.lane.b32.xlu0 %v1089_v3, %s3894_s24  ;;  %3298 = vmatprep.mubr.msk.bf16.mxu0 %vm3892_vm0, %v3891_v29 }
 0x2ff   : > { %1176 = vrot.lane.b32.xlu1 %v1089_v3, %s3895_s19 }
 0x300   : > { %1136 = vrot.lane.b32.xlu0 %v1087_v9, %s3894_s24 }
 0x303   : > { %1148 = vrot.lane.b32.xlu1 %v1087_v9, %s3895_s19 }
 0x304   : > { %1142 = vrot.lane.b32.xlu0 %v1087_v9, %s3893_s27 }
 0x361   : > { %v1169_v23 = vpop.permute.xlu1 %1168  ;;  %v1163_v24 = vpop.permute.xlu0 %1162 }
 0x362   : > { %v1181_v25 = vpack.c.bf16 %v1163_v24, %v1163_v24  ;;  %v1182_v31 = vpack.c.bf16 %v1169_v23, %v1169_v23 }
 0x364   : > { %v1277_v26 = vsel %vm1226_vm1, %v1181_v25, 0  ;;  %v1323_v35 = vsel %vm1226_vm1, %v1182_v31, 0 }
 0x365   : > { %v1141_v27 = vpop.permute.xlu1 %1140  ;;  %v1135_v30 = vpop.permute.xlu0 %1134  ;;  %3267 = vmatpush3.bf16.xpose.msra.mxu1 %v1277_v26 }
 0x366   : > { %3272 = vmatprep.subr.bf16.mxu1 %v3891_v29  ;;  %v1153_v34 = vpack.c.bf16 %v1135_v30, %v1135_v30  ;;  %v1154_v42 = vpack.c.bf16 %v1141_v27, %v1141_v27 }
 0x369   : > { %v1147_v32 = vpop.permute.xlu1 %1146  ;;  %v1175_v33 = vpop.permute.xlu0 %1174 }
 0x36a   : > { %v1183_v40 = vpack.c.bf16 %v1175_v33, %v1175_v33  ;;  %v1155_v52 = vpack.c.bf16 %v1147_v32, %v1147_v32 }
 0x36c   : > { %3269 = vmatmul.mubr.msk.bf16.vlgmr.msra.gmra.mrb[8].mxu1 %vm1226_vm1, %v1153_v34  ;;  %v1369_v45 = vsel %vm1226_vm1, %v1183_v40, 0 }
 0x36d   : > { %v1171_v36 = vpop.permute.xlu1 %1170  ;;  %3273 = vmatpush3.bf16.xpose.msra.mxu1 %v1323_v35  ;;  %3274 = vmatprep.mubr.msk.bf16.mxu1 %vm3892_vm0, %v3891_v29 }
 0x36e   : > { %v1186_v37 = vpack.c.bf16 %v1171_v36, %v1171_v36  ;;  %v1165_v38 = vpop.permute.xlu0 %1164  ;;  %3278 = vmatprep.subr.bf16.mxu1 %v3891_v29 }
 0x36f   : > { %v1185_v51 = vpack.c.bf16 %v1165_v38, %v1165_v38 }
 0x370   : > { %v1507_v41 = vsel %vm1226_vm1, %v1186_v37, 0 }
 0x371   : > { %3297 = vmatpush3.bf16.xpose.msra.mxu0 %v1507_v41  ;;  %v1461_v53 = vsel %vm1226_vm1, %v1185_v51, 0  ;;  %v1177_v54 = vpop.permute.xlu1 %1176 }
 0x372   : > { %v1137_v43 = vpop.permute.xlu0 %1136  ;;  %3308 = vmatprep.subr.bf16.mxu0 %v3891_v29  ;;  %v1187_v55 = vpack.c.bf16 %v1177_v54, %v1177_v54 }
 0x373   : > { %v1157_v58 = vpack.c.bf16 %v1137_v43, %v1137_v43 }
 0x374   : > { %3275 = vmatmul.mubr.msk.bf16.vlgmr.msra.gmra.mrb[12].mxu1 %vm1226_vm1, %v1154_v42  ;;  %v1553_v60 = vsel %vm1226_vm1, %v1187_v55, 0 }
 0x375   : > { %3279 = vmatpush3.bf16.xpose.msra.mxu1 %v1369_v45  ;;  %3280 = vmatprep.mubr.msk.bf16.mxu1 %vm3892_vm0, %v3891_v29  ;;  %v1149_v61 = vpop.permute.xlu1 %1148 }
 0x376   : > { %v1143_v46 = vpop.permute.xlu0 %1142  ;;  %3290 = vmatprep.subr.bf16.mxu1 %v3891_v29  ;;  %v1159_v62 = vpack.c.bf16 %v1149_v61, %v1149_v61 }
 0x377   : > { %v1158_v47 = vpack.c.bf16 %v1143_v46, %v1143_v46 }
 0x379   : > { %3299 = vmatmul.mubr.msk.bf16.vlgmr.msra.gmra.mrb[8].mxu0 %vm1226_vm1, %v1158_v47 }
 0x37a   : > { %3309 = vmatpush3.bf16.msra.mxu0 %v1721_v48  ;;  %3310 = vmatprep.mubr.msk.bf16.mxu0 %vm3892_vm0, %v3891_v29 }
 0x37b   : > { %3320 = vmatprep.subr.bf16.mxu0 %v3891_v29 }
 0x37c   : > { %3281 = vmatmul.mubr.msk.bf16.vlgmr.msra.gmra.mrb[16].mxu1 %vm1226_vm1, %v1155_v52 }
 0x37d   : > { %3291 = vmatpush3.bf16.xpose.msra.mxu1 %v1461_v53  ;;  %3292 = vmatprep.mubr.msk.bf16.mxu1 %vm3892_vm0, %v3891_v29 }
 0x37e   : > { %3302 = vmatprep.subr.bf16.mxu1 %v3891_v29 }
 0x384   : > { %3293 = vmatmul.mubr.msk.bf16.vlgmr.msra.gmra.mrb[20].mxu1 %vm1226_vm1, %v1157_v58 }
 0x385   : > { %3303 = vmatpush3.bf16.xpose.msra.mxu1 %v1553_v60  ;;  %3304 = vmatprep.mubr.msk.bf16.mxu1 %vm3892_vm0, %v3891_v29 }
 0x386   : > { %3314 = vmatprep.subr.bf16.mxu1 %v3891_v29 }
 0x38c   : > { %3305 = vmatmul.mubr.msk.bf16.vlgmr.msra.gmra.mrb[24].mxu1 %vm1226_vm1, %v1159_v62 }
 0x38d   : > { %3316 = vmatprep.mubr.msk.bf16.mxu1 %vm3892_vm0, %v3891_v29 }
 0x3cc   : > { %v1267_v2 = vpop.f32.mrb[4].mxu1 }
 0x3cd   : > { %v1595_v3 = vmul.f32 0.17677669, %v1267_v2  ;;  %v3264_v4 = vpop.f32.mrb[5].mxu1 }
 0x3ce   : > { %v1270_v6 = vpop.f32.mrb[6].mxu1  ;;  %v1451_v7 = vpop.f32.mrb[4].mxu0 }
 0x3cf   : > { %v1599_v8 = vmul.f32 0.17677669, %v1451_v7  ;;  %v3265_v9 = vpop.f32.mrb[7].mxu1  ;;  %v3288_v10 = vpop.f32.mrb[5].mxu0  ;;  %v1611_v11 = vadd.f32 %v1606_v1, %v1595_v3 }
 0x3d0   : > { %v1454_v12 = vpop.f32.mrb[6].mxu0 }
 0x3d1   : > { %v3289_v13 = vpop.f32.mrb[7].mxu0  ;;  %v1620_v14 = vsel %vm1619_vm5, %v1611_v11, -inf  ;;  %v4427_v15 = vadd.f32 %v1610_v5, %v1599_v8 }
 0x3d2   : > { %1621 = vmax.xlane.f32.xlu0 %v1620_v14 }
 0x3d3   : > { %v1632_v27 = vsel %vm1619_vm5, %v4427_v15, -inf }
 0x43f   : > { %v1313_v16 = vpop.f32.mrb[8].mxu1 }
 0x440   : > { %v1596_v18 = vmul.f32 0.17677669, %v1313_v16  ;;  %v3270_v19 = vpop.f32.mrb[9].mxu1 }
 0x441   : > { %v1316_v20 = vpop.f32.mrb[10].mxu1 }
 0x442   : > { %v3271_v21 = vpop.f32.mrb[11].mxu1  ;;  %v1612_v22 = vadd.f32 %v1606_v1, %v1596_v18 }
 0x444   : > { %v1623_v23 = vsel %vm1619_vm5, %v1612_v22, -inf }
 0x445   : > { %1624 = vmax.xlane.f32.xlu1 %v1623_v23 }
 0x447   : > { %v1359_v24 = vpop.f32.mrb[12].mxu1 }
 0x448   : > { %v1597_v25 = vmul.f32 0.17677669, %v1359_v24  ;;  %v3276_v26 = vpop.f32.mrb[13].mxu1 }
 0x449   : > { %1633 = vmax.xlane.f32.xlu1 %v1632_v27  ;;  %v1362_v30 = vpop.f32.mrb[14].mxu1 }
 0x44a   : > { %v3277_v31 = vpop.f32.mrb[15].mxu1  ;;  %v1613_v32 = vadd.f32 %v1606_v1, %v1597_v25 }
 0x44c   : > { %v1543_v33 = vpop.f32.mrb[8].mxu0  ;;  %v1626_v34 = vsel %vm1619_vm5, %v1613_v32, -inf }
 0x44d   : > { %v1601_v35 = vmul.f32 0.17677669, %v1543_v33  ;;  %v3300_v36 = vpop.f32.mrb[9].mxu0  ;;  %1627 = vmax.xlane.f32.xlu0 %v1626_v34 }
 0x44e   : > { %v1546_v37 = vpop.f32.mrb[10].mxu0 }
 0x44f   : > { %v3301_v38 = vpop.f32.mrb[11].mxu0  ;;  %v1405_v40 = vpop.f32.mrb[16].mxu1  ;;  %v1617_v41 = vadd.f32 %v1610_v5, %v1601_v35 }
 0x450   : > { %v1598_v42 = vmul.f32 0.17677669, %v1405_v40  ;;  %v3282_v43 = vpop.f32.mrb[17].mxu1 }
 0x451   : > { %v1638_v44 = vsel %vm1619_vm5, %v1617_v41, -inf  ;;  %v1408_v45 = vpop.f32.mrb[18].mxu1 }
 0x452   : > { %1639 = vmax.xlane.f32.xlu1 %v1638_v44  ;;  %v3283_v46 = vpop.f32.mrb[19].mxu1  ;;  %v1614_v47 = vadd.f32 %v1606_v1, %v1598_v42 }
 0x454   : > { %v1629_v48 = vsel %vm1619_vm5, %v1614_v47, -inf }
 0x455   : > { %1630 = vmax.xlane.f32.xlu0 %v1629_v48 }
 0x457   : > { %v1497_v51 = vpop.f32.mrb[20].mxu1 }
 0x458   : > { %v1600_v52 = vmul.f32 0.17677669, %v1497_v51  ;;  %v3294_v53 = vpop.f32.mrb[21].mxu1 }
 0x459   : > { %v1500_v54 = vpop.f32.mrb[22].mxu1 }
 0x45a   : > { %v3295_v55 = vpop.f32.mrb[23].mxu1  ;;  %v1616_v58 = vadd.f32 %v1610_v5, %v1600_v52 }
 0x45c   : > { %v1635_v60 = vsel %vm1619_vm5, %v1616_v58, -inf }
 0x45d   : > { %1636 = vmax.xlane.f32.xlu0 %v1635_v60 }
 0x45f   : > { %v1589_v61 = vpop.f32.mrb[24].mxu1  ;;  %v1622_v4 = vpop.xlane.xlu0 %1621 }
 0x460   : > { %v1602_v62 = vmul.f32 0.17677669, %v1589_v61  ;;  %v3306_v63 = vpop.f32.mrb[25].mxu1  ;;  %v1644_v6 = vsub.f32 %v1611_v11, %v1622_v4 }
 0x461   : > { %v1592_v0 = vpop.f32.mrb[26].mxu1 }
 0x462   : > { %v3307_v2 = vpop.f32.mrb[27].mxu1  ;;  %v1618_v3 = vadd.f32 %v1610_v5, %v1602_v62  ;;  %v1652_v7 = vmul.f32 1.442695, %v1644_v6 }
 0x463   : > { %1190 = vrot.lane.b32.xlu1 %v4392_v39, %s3894_s24 }
 0x464   : > { %v1641_v1 = vsel %vm1619_vm5, %v1618_v3, -inf  ;;  %3587 = vpow2.f32 %v1652_v7 }
 0x465   : > { %1642 = vmax.xlane.f32.xlu0 %v1641_v1 }
 0x46e   : > { %v4439_v8 = vpop.eup %3587 }
 0x46f   : > { %v1668_v9 = vsel %vm1619_vm5, %v4439_v8, 0.0 }
 0x487   : > { %1669 = vadd.xlane.f32.xlu1 %v1668_v9 }
 0x4d2   : > { %v1625_v10 = vpop.xlane.xlu1 %1624 }
 0x4d3   : > { %v1645_v12 = vsub.f32 %v1612_v22, %v1625_v10 }
 0x4d5   : > { %v1654_v13 = vmul.f32 1.442695, %v1645_v12 }
 0x4d6   : > { %v1634_v5 = vpop.xlane.xlu1 %1633 }
 0x4d7   : > { %3589 = vpow2.f32 %v1654_v13  ;;  %v1648_v14 = vsub.f32 %v4427_v15, %v1634_v5 }
 0x4d9   : > { %v1660_v16 = vmul.f32 1.442695, %v1648_v14 }
 0x4da   : > { %v1628_v18 = vpop.xlane.xlu0 %1627 }
 0x4db   : > { %3591 = vpow2.f32 %v1660_v16  ;;  %v1646_v19 = vsub.f32 %v1613_v32, %v1628_v18 }
 0x4dd   : > { %v1656_v11 = vmul.f32 1.442695, %v1646_v19 }
 0x4df   : > { %3593 = vpow2.f32 %v1656_v11  ;;  %v1640_v20 = vpop.xlane.xlu1 %1639 }
 0x4e0   : > { %v1650_v21 = vsub.f32 %v1617_v41, %v1640_v20 }
 0x4e1   : > { %v3590_v23 = vpop.eup %3589 }
 0x4e2   : > { %v1664_v24 = vmul.f32 1.442695, %v1650_v21  ;;  %v1631_v25 = vpop.xlane.xlu0 %1630  ;;  %v1671_v26 = vsel %vm1619_vm5, %v3590_v23, 0.0 }
 0x4e3   : > { %v1191_v27 = vpop.permute.xlu1 %1190  ;;  %v1647_v22 = vsub.f32 %v1614_v47, %v1631_v25  ;;  %1672 = vadd.xlane.f32.xlu0 %v1671_v26 }
 0x4e4   : > { %3595 = vpow2.f32 %v1664_v24  ;;  %v1209_v30 = vpack.c.bf16 %v1191_v27, %v1191_v27 }
 0x4e5   : > { %v4445_v31 = vpop.eup %3591  ;;  %v1658_v15 = vmul.f32 1.442695, %v1647_v22  ;;  %v1212_v22 = vpack.c.bf16 %v4377_v17, %v4377_v17 }
 0x4e6   : > { %v1767_v33 = vsel %vm1719_vm3, %v1209_v30, 0  ;;  %v1680_v32 = vsel %vm1619_vm5, %v4445_v31, 0.0 }
 0x4e7   : > { %3597 = vpow2.f32 %v1658_v15  ;;  %3315 = vmatpush3.bf16.msra.mxu1 %v1767_v33  ;;  %1681 = vadd.xlane.f32.xlu1 %v1680_v32 }
 0x4e8   : > { %3326 = vmatprep.subr.bf16.mxu1 %v3891_v29 }
 0x4e9   : > { %v4451_v34 = vpop.eup %3593 }
 0x4ea   : > { %v1637_v35 = vpop.xlane.xlu0 %1636  ;;  %v1674_v36 = vsel %vm1619_vm5, %v4451_v34, 0.0 }
 0x4eb   : > { %v1649_v37 = vsub.f32 %v1616_v58, %v1637_v35  ;;  %1675 = vadd.xlane.f32.xlu1 %v1674_v36 }
 0x4ed   : > { %v1662_v38 = vmul.f32 1.442695, %v1649_v37 }
 0x4ee   : > { %v4455_v40 = vpop.eup %3595 }
 0x4ef   : > { %3599 = vpow2.f32 %v1662_v38  ;;  %v1686_v41 = vsel %vm1619_vm5, %v4455_v40, 0.0 }
 0x4f0   : > { %1687 = vadd.xlane.f32.xlu0 %v1686_v41 }
 0x4f1   : > { %v3598_v42 = vpop.eup %3597 }
 0x4f2   : > { %v1643_v43 = vpop.xlane.xlu0 %1642  ;;  %v1677_v44 = vsel %vm1619_vm5, %v3598_v42, 0.0 }
 0x4f3   : > { %v1651_v45 = vsub.f32 %v1618_v3, %v1643_v43 }
 0x4f4   : > { %1678 = vadd.xlane.f32.xlu0 %v1677_v44 }
 0x4f5   : > { %v1666_v46 = vmul.f32 1.442695, %v1651_v45 }
 0x4f7   : > { %3601 = vpow2.f32 %v1666_v46 }
 0x4f9   : > { %v3600_v47 = vpop.eup %3599 }
 0x4fa   : > { %v1683_v48 = vsel %vm1619_vm5, %v3600_v47, 0.0 }
 0x4fb   : > { %1684 = vadd.xlane.f32.xlu0 %v1683_v48  ;;  %v3540_v48 = vld [vmem:[%s4218_s11 + $0x8] sm:$0xff]  }
 0x4fc   : > { %1202 = vrot.lane.b32.xlu1 %v4392_v39, %s3895_s19 }
 0x500   : > { %1192 = vrot.lane.b32.xlu1 %v4377_v17, %s3894_s24 }
 0x501   : > { %v4465_v51 = vpop.eup %3601 }
 0x502   : > { %v1689_v52 = vsel %vm1619_vm5, %v4465_v51, 0.0 }
 0x503   : > { %1690 = vadd.xlane.f32.xlu0 %v1689_v52 }
 0x504   : > { %1198 = vrot.lane.b32.xlu1 %v4377_v17, %s3893_s27 }
 0x508   : > { %1204 = vrot.lane.b32.xlu1 %v4377_v17, %s3895_s19 }
 0x514   : > { %v1670_v53 = vpop.xlane.xlu1 %1669 }
 0x515   : > { %3603 = vrcp.f32 %v1670_v53 }
 0x519   : > { %1196 = vrot.lane.b32.xlu0 %v4392_v39, %s3893_s27 }
 0x51f   : > { %v3604_v54 = vpop.eup %3603 }
 0x520   : > { %v1700_v55 = vmul.f32 %v3604_v54, %v4439_v8  ;;  %v3541_v54 = vld [vmem:[%s4218_s11 + $0x10] sm:$0xff]  }
 0x522   : > { %v1708_v58 = vpack.c.bf16 %v1700_v55, %v1700_v55 }
 0x524   : > { %3311 = vmatmul.mubr.msk.bf16.vlgmr.msra.gmra.mrb[12].mxu0 %vm1619_vm5, %v1708_v58 }
 0x525   : > { %3322 = vmatprep.mubr.msk.bf16.mxu0 %vm3892_vm0, %v3891_v29 }
 0x570   : > { %v1673_v60 = vpop.xlane.xlu0 %1672 }
 0x571   : > { %3605 = vrcp.f32 %v1673_v60  ;;  %v3542_v60 = vld [vmem:[%s4218_s11 + $0x18] sm:$0xff]  }
 0x574   : > { %v1682_v61 = vpop.xlane.xlu1 %1681 }
 0x578   : > { %v1676_v62 = vpop.xlane.xlu1 %1675 }
 0x57b   : > { %v3606_v63 = vpop.eup %3605 }
 0x57c   : > { %v1701_v0 = vmul.f32 %v3606_v63, %v3590_v23  ;;  %v1203_v2 = vpop.permute.xlu1 %1202  ;;  %v3543_v63 = vld [vmem:[%s4218_s11 + $0x20] sm:$0xff]  }
 0x57d   : > { %v1211_v3 = vpack.c.bf16 %v1203_v2, %v1203_v2  ;;  %v1688_v1 = vpop.xlane.xlu0 %1687 }
 0x57e   : > { %v1709_v4 = vpack.c.bf16 %v1701_v0, %v1701_v0 }
 0x57f   : > { %v1859_v39 = vsel %vm1719_vm3, %v1211_v3, 0 }
 0x580   : > { %3317 = vmatmul.mubr.msk.bf16.vlgmr.msra.gmra.mrb[28].mxu1 %vm1619_vm5, %v1709_v4  ;;  %v1193_v7 = vpop.permute.xlu1 %1192 }
 0x581   : > { %3327 = vmatpush3.bf16.msra.mxu1 %v1859_v39  ;;  %v1679_v6 = vpop.xlane.xlu0 %1678  ;;  %3328 = vmatprep.mubr.msk.bf16.mxu1 %vm3892_vm0, %v3891_v29  ;;  %v1213_v12 = vpack.c.bf16 %v1193_v7, %v1193_v7 }
 0x582   : > { %3607 = vrcp.f32 %v1679_v6  ;;  %3338 = vmatprep.subr.bf16.mxu1 %v3891_v29 }
 0x583   : > { %3609 = vrcp.f32 %v1676_v62  ;;  %v1951_v16 = vsel %vm1719_vm3, %v1213_v12, 0 }
 0x584   : > { %v1199_v10 = vpop.permute.xlu1 %1198 }
 0x585   : > { %v1214_v37 = vpack.c.bf16 %v1199_v10, %v1199_v10  ;;  %v3545_v10 = vld [vmem:[%s4218_s11 + $0x30] sm:$0xff]  }
 0x588   : > { %v1685_v8 = vpop.xlane.xlu0 %1684  ;;  %v1205_v19 = vpop.permute.xlu1 %1204 }
 0x589   : > { %3611 = vrcp.f32 %v1685_v8  ;;  %v1215_v24 = vpack.c.bf16 %v1205_v19, %v1205_v19 }
 0x58a   : > { %3613 = vrcp.f32 %v1682_v61 }
 0x58b   : > { %v2043_v30 = vsel %vm1719_vm3, %v1215_v24, 0 }
 0x58c   : > { %v3608_v9 = vpop.eup %3607 }
 0x58d   : > { %v1703_v13 = vmul.f32 %v3608_v9, %v3598_v42  ;;  %v3610_v18 = vpop.eup %3609  ;;  %v1997_v42 = vsel %vm1719_vm3, %v1214_v37, 0 }
 0x58e   : > { %v1702_v23 = vmul.f32 %v3610_v18, %v4451_v34  ;;  %v1905_v34 = vsel %vm1719_vm3, %v1212_v22, 0  ;;  %v3546_v18 = vld [vmem:[%s4218_s11 + $0x38] sm:$0xff]  }
 0x58f   : > { %v1711_v5 = vpack.c.bf16 %v1703_v13, %v1703_v13 }
 0x590   : > { %v1691_v14 = vpop.xlane.xlu0 %1690  ;;  %v1710_v15 = vpack.c.bf16 %v1702_v23, %v1702_v23 }
 0x591   : > { %3329 = vmatmul.mubr.msk.bf16.vlgmr.msra.gmra.mrb[32].mxu1 %vm1619_vm5, %v1711_v5  ;;  %3615 = vrcp.f32 %v1691_v14 }
 0x592   : > { %3339 = vmatpush3.bf16.msra.mxu1 %v1951_v16  ;;  %3340 = vmatprep.mubr.msk.bf16.mxu1 %vm3892_vm0, %v3891_v29  ;;  %3617 = vrcp.f32 %v1688_v1  ;;  %v3544_v1 = vld [vmem:[%s4218_s11 + $0x28] sm:$0xff]  }
 0x593   : > { %v3612_v11 = vpop.eup %3611  ;;  %3350 = vmatprep.subr.bf16.mxu1 %v3891_v29 }
 0x594   : > { %v1705_v20 = vmul.f32 %v3612_v11, %v3600_v47  ;;  %v1197_v21 = vpop.permute.xlu0 %1196  ;;  %v3614_v33 = vpop.eup %3613  ;;  %v3539_v47 = vld [vmem:[%s4218_s11] sm:$0xff]  }
 0x595   : > { %v1210_v25 = vpack.c.bf16 %v1197_v21, %v1197_v21  ;;  %v1704_v35 = vmul.f32 %v3614_v33, %v4445_v31 }
 0x596   : > { %v1713_v26 = vpack.c.bf16 %v1705_v20, %v1705_v20 }
 0x597   : > { %v1813_v27 = vsel %vm1719_vm3, %v1210_v25, 0  ;;  %v1712_v38 = vpack.c.bf16 %v1704_v35, %v1704_v35 }
 0x598   : > { %3321 = vmatpush3.bf16.msra.mxu0 %v1813_v27 }
 0x599   : > { %3341 = vmatmul.mubr.msk.bf16.vlgmr.msra.gmra.mrb[36].mxu1 %vm1619_vm5, %v1713_v26  ;;  %3332 = vmatprep.subr.bf16.mxu0 %v3891_v29 }
 0x59a   : > { %3351 = vmatpush3.bf16.msra.mxu1 %v2043_v30  ;;  %3352 = vmatprep.mubr.msk.bf16.mxu1 %vm3892_vm0, %v3891_v29 }
 0x59b   : > { %v3616_v32 = vpop.eup %3615  ;;  %3323 = vmatmul.mubr.msk.bf16.vlgmr.msra.gmra.mrb[16].mxu0 %vm1619_vm5, %v1710_v15 }
 0x59c   : > { %v1707_v17 = vmul.f32 %v3616_v32, %v4465_v51  ;;  %3333 = vmatpush3.bf16.msra.mxu0 %v1905_v34  ;;  %3334 = vmatprep.mubr.msk.bf16.mxu0 %vm3892_vm0, %v3891_v29  ;;  %v3618_v41 = vpop.eup %3617 }
 0x59d   : > { %3344 = vmatprep.subr.bf16.mxu0 %v3891_v29  ;;  %v1706_v31 = vmul.f32 %v3618_v41, %v4455_v40 }
 0x59e   : > { %v1715_v36 = vpack.c.bf16 %v1707_v17, %v1707_v17 }
 0x59f   : > { %v1714_v43 = vpack.c.bf16 %v1706_v31, %v1706_v31 }
 0x5a1   : > { %3353 = vmatmul.mubr.msk.bf16.vlgmr.msra.gmra.mrb[40].mxu1 %vm1619_vm5, %v1715_v36 }
 0x5a2   : > { %2414 = vmatprep.mubr.bf16.mxu1 %v3890_v28 }
 0x5a3   : > { %3335 = vmatmul.mubr.msk.bf16.vlgmr.msra.gmra.mrb[20].mxu0 %vm1619_vm5, %v1712_v38 }
 0x5a4   : > { %3345 = vmatpush3.bf16.msra.mxu0 %v1997_v42  ;;  %3346 = vmatprep.mubr.msk.bf16.mxu0 %vm3892_vm0, %v3891_v29 }
 0x5a5   : > { %3356 = vmatprep.subr.bf16.mxu0 %v3891_v29 }
 0x5ab   : > { %3347 = vmatmul.mubr.msk.bf16.vlgmr.msra.gmra.mrb[24].mxu0 %vm1619_vm5, %v1714_v43 }
 0x5ac   : > { %3372 = vmatprep.mubr.msk.bf16.mxu0 %vm3892_vm0, %v3891_v29  ;;  %3357 = vmatpush3.bf16.msra.mxu0 %v3539_v47 }
 0x5ad   : > { %3358 = vmatprep.subr.bf16.mxu0 %v3891_v29 }
 0x5b0   : > { %3359 = vmatpush3.bf16.msra.mxu0 %v3540_v48 }
 0x5b1   : > { %3360 = vmatprep.subr.bf16.mxu0 %v3891_v29 }
 0x5b4   : > { %3361 = vmatpush3.bf16.msra.mxu0 %v3541_v54  ;;  %v3549_v54 = vld [vmem:[%s4225_s26 + $0x4] ss:$8 sps:$4 sm:$0xff]  }
 0x5b5   : > { %3362 = vmatprep.subr.bf16.mxu0 %v3891_v29  ;;  %2382 = vmatprep.subr.bf16.mxu1 %v3549_v54 }
 0x5b8   : > { %3363 = vmatpush3.bf16.msra.mxu0 %v3542_v60 }
 0x5b9   : > { %3364 = vmatprep.subr.bf16.mxu0 %v3891_v29 }
 0x5bc   : > { %3365 = vmatpush3.bf16.msra.mxu0 %v3543_v63 }
 0x5bd   : > { %3366 = vmatprep.subr.bf16.mxu0 %v3891_v29 }
 0x5c0   : > { %3367 = vmatpush3.bf16.msra.mxu0 %v3544_v1  ;;  %v3553_v1 = vld [vmem:[%s4225_s26 + $0x20] ss:$8 sps:$4 sm:$0xff]  }
 0x5c1   : > { %3368 = vmatprep.subr.bf16.mxu0 %v3891_v29 }
 0x5c4   : > { %3369 = vmatpush3.bf16.msra.mxu0 %v3545_v10  ;;  %v3565_v10 = vld [vmem:[%s4225_s26 + $0x60] ss:$8 sps:$4 sm:$0xff]  }
 0x5c5   : > { %3370 = vmatprep.subr.bf16.mxu0 %v3891_v29 }
 0x5c8   : > { %3371 = vmatpush3.bf16.msra.mxu0 %v3546_v18 }
 0x5f7   : > { %v4516_v28 = vpop.f32.mrb[12].mxu0 }
 0x5f8   : > { %v3312_v44 = vpop.f32.mrb[13].mxu0 }
 0x5f9   : > { %v1760_v45 = vpop.f32.mrb[14].mxu0  ;;  %v3094_v44 = vld [vmem:[%s4760_s13] ss:$0 sm:$0xff] }
 0x5fa   : > { %v3313_v46 = vpop.f32.mrb[15].mxu0 }
 0x653   : > { %v1803_v40 = vpop.f32.mrb[28].mxu1 }
 0x654   : > { %v3318_v51 = vpop.f32.mrb[29].mxu1 }
 0x655   : > { %v1806_v52 = vpop.f32.mrb[30].mxu1 }
 0x656   : > { %v3319_v53 = vpop.f32.mrb[31].mxu1 }
 0x657   : > { %v3547_v53 = vld [vmem:[%s4225_s26] ss:$8 sps:$4 sm:$0xff]  }
 0x658   : > { %2383 = vmatpush1.bf16.msra.mxu1 %v3547_v53 }
 0x664   : > { %v1895_v55 = vpop.f32.mrb[32].mxu1 }
 0x665   : > { %v3330_v58 = vpop.f32.mrb[33].mxu1 }
 0x666   : > { %v1898_v61 = vpop.f32.mrb[34].mxu1  ;;  %v3550_v58 = vld [vmem:[%s4225_s26 + $0x10] ss:$8 sps:$4 sm:$0xff]  }
 0x667   : > { %v3331_v62 = vpop.f32.mrb[35].mxu1 }
 0x66c   : > { %v1987_v0 = vpop.f32.mrb[36].mxu1 }
 0x66d   : > { %v3492_v2 = vpack.i.bf16 %v1987_v0, %v1803_v40  ;;  %v3342_v3 = vpop.f32.mrb[37].mxu1 }
 0x66e   : > { %v1990_v4 = vpop.f32.mrb[38].mxu1  ;;  %v1849_v39 = vpop.f32.mrb[16].mxu0  ;;  %v3555_v3 = vld [vmem:[%s4225_s26 + $0x24] ss:$8 sps:$4 sm:$0xff]  }
 0x66f   : > { %3493 = vrot.lane.b32.xlu0 %v3492_v2, %s3895_s19  ;;  %v3343_v6 = vpop.f32.mrb[39].mxu1  ;;  %v3324_v7 = vpop.f32.mrb[17].mxu0  ;;  %v3558_v4 = vld [vmem:[%s4225_s26 + $0x34] ss:$8 sps:$4 sm:$0xff]  }
 0x670   : > { %v1852_v8 = vpop.f32.mrb[18].mxu0  ;;  %v3561_v6 = vld [vmem:[%s4225_s26 + $0x44] ss:$8 sps:$4 sm:$0xff]   ;;  %v3559_v7 = vld [vmem:[%s4225_s26 + $0x40] ss:$8 sps:$4 sm:$0xff]  }
 0x671   : > { %v3325_v9 = vpop.f32.mrb[19].mxu0  ;;  %v3564_v8 = vld [vmem:[%s4225_s26 + $0x54] ss:$8 sps:$4 sm:$0xff]  }
 0x672   : > { %v3562_v9 = vld [vmem:[%s4225_s26 + $0x50] ss:$8 sps:$4 sm:$0xff]  }
 0x674   : > { %v2079_v12 = vpop.f32.mrb[40].mxu1 }
 0x675   : > { %v3502_v13 = vpack.i.bf16 %v2079_v12, %v1895_v55  ;;  %v3354_v5 = vpop.f32.mrb[41].mxu1  ;;  %v3552_v55 = vld [vmem:[%s4225_s26 + $0x14] ss:$8 sps:$4 sm:$0xff]   ;;  %v3567_v12 = vld [vmem:[%s4225_s26 + $0x64] ss:$8 sps:$4 sm:$0xff]  }
 0x676   : > { %v2082_v14 = vpop.f32.mrb[42].mxu1  ;;  %v1941_v16 = vpop.f32.mrb[20].mxu0  ;;  %2384 = vmatprep.subr.bf16.mxu1 %v3552_v55  ;;  %v3568_v5 = vld [vmem:[%s4225_s26 + $0x70] ss:$8 sps:$4 sm:$0xff]  }
 0x677   : > { %3503 = vrot.lane.b32.xlu0 %v3502_v13, %s3894_s24  ;;  %v3355_v19 = vpop.f32.mrb[43].mxu1  ;;  %v3336_v11 = vpop.f32.mrb[21].mxu0  ;;  %2385 = vmatpush1.bf16.msra.mxu1 %v3550_v58  ;;  %v3570_v13 = vld [vmem:[%s4225_s26 + $0x74] ss:$8 sps:$4 sm:$0xff]  }
 0x678   : > { %v1944_v20 = vpop.f32.mrb[22].mxu0  ;;  %2386 = vmatprep.subr.bf16.mxu1 %v3555_v3 }
 0x679   : > { %v3337_v21 = vpop.f32.mrb[23].mxu0 }
 0x67b   : > { %2387 = vmatpush1.bf16.msra.mxu1 %v3553_v1 }
 0x67c   : > { %2388 = vmatprep.subr.bf16.mxu1 %v3558_v4 }
 0x67e   : > { %v2033_v23 = vpop.f32.mrb[24].mxu0 }
 0x67f   : > { %v3497_v24 = vpack.i.bf16 %v2033_v23, %v1849_v39  ;;  %v3348_v25 = vpop.f32.mrb[25].mxu0  ;;  %v3556_v39 = vld [vmem:[%s4225_s26 + $0x30] ss:$8 sps:$4 sm:$0xff]   ;;  %v3103_v23 = vld [vmem:[%s4761_s6] ss:$0 sm:$0xff] }
 0x680   : > { %v2036_v26 = vpop.f32.mrb[26].mxu0  ;;  %2389 = vmatpush1.bf16.msra.mxu1 %v3556_v39 }
 0x681   : > { %3498 = vrot.lane.b32.xlu1 %v3497_v24, %s3893_s27  ;;  %v3349_v27 = vpop.f32.mrb[27].mxu0  ;;  %2390 = vmatprep.subr.bf16.mxu1 %v3561_v6 }
 0x684   : > { %2391 = vmatpush1.bf16.msra.mxu1 %v3559_v7 }
 0x685   : > { %2392 = vmatprep.subr.bf16.mxu1 %v3564_v8 }
 0x688   : > { %2393 = vmatpush1.bf16.msra.mxu1 %v3562_v9 }
 0x689   : > { %2394 = vmatprep.subr.bf16.mxu1 %v3567_v12 }
 0x68c   : > { %2395 = vmatpush1.bf16.msra.mxu1 %v3565_v10 }
 0x68d   : > { %2396 = vmatprep.subr.bf16.mxu1 %v3570_v13 }
 0x690   : > { %2397 = vmatpush1.bf16.msra.mxu1 %v3568_v5 }
 0x6e1   : > { %v3494_v22 = vpop.permute.xlu0 %3493 }
 0x6e2   : > { %v3496_v30 = vunpack.i.h.bf16 %v3494_v22  ;;  %v3495_v15 = vunpack.i.l.bf16 %v3494_v22  ;;  %v3104_v22 = vld [vmem:[%s4763_s12] ss:$0 sm:$0xff] }
 0x6e4   : > { %v2110_v17 = vsel %vm1226_vm1, %v1941_v16, %v3496_v30  ;;  %v2109_v35 = vsel %vm1226_vm1, %v4516_v28, %v3495_v15 }
 0x6e9   : > { %v3504_v33 = vpop.permute.xlu0 %3503 }
 0x6ea   : > { %v3506_v36 = vunpack.i.h.bf16 %v3504_v33  ;;  %v3505_v37 = vunpack.i.l.bf16 %v3504_v33 }
 0x6f3   : > { %v3499_v29 = vpop.permute.xlu1 %3498 }
 0x6f4   : > { %v3501_v32 = vunpack.i.h.bf16 %v3499_v29  ;;  %v3500_v34 = vunpack.i.l.bf16 %v3499_v29 }
 0x6f6   : > { %v2112_v38 = vsel %vm2111_vm6, %v2109_v35, %v3500_v34  ;;  %v2113_v41 = vsel %vm2111_vm6, %v2110_v17, %v3501_v32  ;;  %v3571_v32 = vld [vmem:[%s4231_s21 + $0x40] sm:$0xff]   ;;  %v3573_v17 = vld [vmem:[%s4231_s21 + $0x48] sm:$0xff]  }
 0x6f7   : > { %v2115_v42 = vsel %vm2114_vm7, %v2112_v38, %v3505_v37  ;;  %v2116_v31 = vsel %vm2114_vm7, %v2113_v41, %v3506_v36  ;;  %v3572_v34 = vld [vmem:[%s4231_s21] sm:$0xff]   ;;  %3209 = vmatprep.subr.bf16.mxu0 %v3571_v32  ;;  %v3574_v35 = vld [vmem:[%s4231_s21 + $0x8] sm:$0xff]   ;;  %v3575_v36 = vld [vmem:[%s4231_s21 + $0x50] sm:$0xff]  }
 0x6f8   : > { %v2117_v43 = vpack.c.bf16 %v2116_v31, %v2115_v42  ;;  %v3576_v37 = vld [vmem:[%s4231_s21 + $0x10] sm:$0xff]   ;;  %v3577_v38 = vld [vmem:[%s4231_s21 + $0x58] sm:$0xff]   ;;  %v3579_v42 = vld [vmem:[%s4231_s21 + $0x60] sm:$0xff]  }
 0x6f9   : > { %v3578_v41 = vld [vmem:[%s4231_s21 + $0x18] sm:$0xff]   ;;  %v3580_v31 = vld [vmem:[%s4231_s21 + $0x20] sm:$0xff]  }
 0x6fa   : > { %3373 = vmatmul.mubr.bf16.vlgmr.msra.gmra.mrb[28].mxu0 %v2117_v43  ;;  %v3581_v43 = vld [vmem:[%s4231_s21 + $0x68] sm:$0xff]  }
 0x6fb   : > { %3210 = vmatpush3.bf16.msra.mxu0 %v3572_v34 }
 0x6fc   : > { %3211 = vmatprep.subr.bf16.mxu0 %v3573_v17 }
 0x6ff   : > { %3212 = vmatpush3.bf16.msra.mxu0 %v3574_v35 }
 0x700   : > { %3213 = vmatprep.subr.bf16.mxu0 %v3575_v36  ;;  %v3121_v36 = vld [vmem:[%s811_s1] ss:$0 sm:$0xff] }
 0x703   : > { %3214 = vmatpush3.bf16.msra.mxu0 %v3576_v37 }
 0x704   : > { %3215 = vmatprep.subr.bf16.mxu0 %v3577_v38 }
 0x707   : > { %3216 = vmatpush3.bf16.msra.mxu0 %v3578_v41 }
 0x708   : > { %3217 = vmatprep.subr.bf16.mxu0 %v3579_v42 }
 0x70b   : > { %3218 = vmatpush3.bf16.msra.mxu0 %v3580_v31 }
 0x70c   : > { %3219 = vmatprep.subr.bf16.mxu0 %v3581_v43 }
 0x7cd   : > { %v2223_v45 = vpop.f32.mrb[28].mxu0 }
 0x7ce   : > { %v2224_v46 = vadd.f32 %v3094_v44, %v2223_v45  ;;  %v3374_v28 = vpop.f32.mrb[29].mxu0  ;;  %v3583_v45 = vld [vmem:[%s4231_s21 + $0x70] sm:$0xff]  }
 0x7cf   : > { %v2226_v47 = vpop.f32.mrb[30].mxu0  ;;  %v3585_v28 = vld [vmem:[%s4231_s21 + $0x78] sm:$0xff]  }
 0x7d0   : > { %v2227_v48 = vadd.f32 %v3094_v44, %v2226_v47  ;;  %v3375_v40 = vpop.f32.mrb[31].mxu0  ;;  %v2230_v51 = vadd.f32 %v2224_v46, %v4323_v49  ;;  %v3582_v44 = vld [vmem:[%s4231_s21 + $0x28] sm:$0xff]   ;;  %v3584_v46 = vld [vmem:[%s4231_s21 + $0x30] sm:$0xff]   ;;  %v3586_v47 = vld [vmem:[%s4231_s21 + $0x38] sm:$0xff]  }
 0x7d1   : > { %3220 = vmatpush3.bf16.msra.mxu0 %v3582_v44 }
 0x7d2   : > { %2234 = vadd.xlane.f32.xlu1 %v2230_v51  ;;  %v2231_v52 = vadd.f32 %v2227_v48, %v4325_v50  ;;  %3221 = vmatprep.subr.bf16.mxu0 %v3583_v45  ;;  %v2290_v48 = vld [vmem:[%s4269_s3] sm:$0x3] }
 0x7d3   : > { %v2295_v40 = vrot.slane %v2290_v48, %v4349_v59 }
 0x7d4   : > { %2236 = vadd.xlane.f32.xlu0 %v2231_v52 }
 0x7d5   : > { %3222 = vmatpush3.bf16.msra.mxu0 %v3584_v46 }
 0x7d6   : > { %3223 = vmatprep.subr.bf16.mxu0 %v3585_v28 }
 0x7d9   : > { %3224 = vmatpush3.bf16.msra.mxu0 %v3586_v47 }
 0x85f   : > { %v2235_v60 = vpop.xlane.xlu1 %2234 }
 0x860   : > { %v2239_v61 = vmul.f32 0.0078125, %v2235_v60 }
 0x861   : > { %v2237_v62 = vpop.xlane.xlu0 %2236 }
 0x862   : > { %v2241_v49 = vsub.f32 %v2230_v51, %v2239_v61  ;;  %v2240_v50 = vmul.f32 0.0078125, %v2237_v62  ;;  %v2299_v51 = vrot.slane %v2290_v48, %v911_v57 }
 0x864   : > { %v2242_v63 = vsub.f32 %v2231_v52, %v2240_v50  ;;  %v2243_v0 = vmul.f32 %v2241_v49, %v2241_v49 }
 0x866   : > { %2245 = vadd.xlane.f32.xlu0 %v2243_v0  ;;  %v2244_v2 = vmul.f32 %v2242_v63, %v2242_v63 }
 0x868   : > { %2247 = vadd.xlane.f32.xlu1 %v2244_v2 }
 0x8f3   : > { %v2246_v14 = vpop.xlane.xlu0 %2245 }
 0x8f4   : > { %v2249_v16 = vmul.f32 0.0078125, %v2246_v14 }
 0x8f5   : > { %v2248_v18 = vpop.xlane.xlu1 %2247 }
 0x8f6   : > { %v2251_v19 = vadd.f32 1e-05, %v2249_v16  ;;  %v2250_v11 = vmul.f32 0.0078125, %v2248_v18 }
 0x8f8   : > { %3619 = vrsqrt.f32 %v2251_v19  ;;  %v2252_v20 = vadd.f32 1e-05, %v2250_v11 }
 0x8fa   : > { %3621 = vrsqrt.f32 %v2252_v20 }
 0x902   : > { %v3620_v21 = vpop.eup %3619 }
 0x903   : > { %v2255_v24 = vmul.f32 %v3620_v21, %v2241_v49 }
 0x904   : > { %v3622_v25 = vpop.eup %3621 }
 0x905   : > { %v2256_v26 = vmul.f32 %v3622_v25, %v2242_v63  ;;  %v2263_v27 = vmul.f32 %v3103_v23, %v2255_v24 }
 0x907   : > { %v2264_v30 = vmul.f32 %v3103_v23, %v2256_v26  ;;  %v4572_v15 = vadd.f32 %v3104_v22, %v2263_v27 }
 0x909   : > { %v4574_v33 = vadd.f32 %v3104_v22, %v2264_v30 }
 0x90b   : > { %v2273_v29 = vpack.c.bf16 %v4574_v33, %v4572_v15 }
 0x90d   : > { %2415 = vmatmul.mubr.bf16.vlgmr.msra.gmra.mrb[44].mxu1 %v2273_v29 }
 0x9e0   : > { %v2416_v52 = vpop.f32.mrb[44].mxu1 }
 0x9e1   : > { %v2417_v53 = vadd.f32 %v2416_v52, %v2295_v40  ;;  %v2418_v54 = vpop.f32.mrb[45].mxu1 }
 0x9e2   : > { %v2419_v55 = vadd.f32 %v2418_v54, %v2299_v51  ;;  %v2420_v58 = vpop.f32.mrb[46].mxu1 }
 0x9e3   : > { %v2429_v60 = vmul.f32 0.044715, %v2417_v53  ;;  %v2421_v61 = vadd.f32 %v2420_v58, %v2295_v40  ;;  %v2422_v62 = vpop.f32.mrb[47].mxu1  ;;  %v2425_v21 = vmul.f32 0.5, %v2417_v53 }
 0x9e4   : > { %v2430_v49 = vmul.f32 0.044715, %v2419_v55  ;;  %v2423_v50 = vadd.f32 %v2422_v62, %v2299_v51  ;;  %v2426_v25 = vmul.f32 0.5, %v2419_v55 }
 0x9e5   : > { %v2433_v63 = vmul.f32 %v2429_v60, %v2417_v53  ;;  %v2431_v0 = vmul.f32 0.044715, %v2421_v61  ;;  %v2427_v23 = vmul.f32 0.5, %v2421_v61 }
 0x9e6   : > { %v2434_v2 = vmul.f32 %v2430_v49, %v2419_v55  ;;  %v2432_v3 = vmul.f32 0.044715, %v2423_v50  ;;  %v2428_v26 = vmul.f32 0.5, %v2423_v50  ;;  %v3138_v49 = vld [vmem:[%s814_s20] ss:$0 sm:$0xff] }
 0x9e7   : > { %v2437_v1 = vmul.f32 %v2433_v63, %v2417_v53  ;;  %v2435_v4 = vmul.f32 %v2431_v0, %v2421_v61  ;;  %v3139_v0 = vld [vmem:[%s817_s17] ss:$0 sm:$0xff]  ;;  %s4767_s17 = sld [smem:[#allocation38_spill]] (!%p3140_p9) }
 0x9e8   : > { %v2438_v59 = vmul.f32 %v2434_v2, %v2419_v55  ;;  %v2436_v39 = vmul.f32 %v2432_v3, %v2423_v50 }
 0x9e9   : > { %v2441_v56 = vadd.f32 %v2437_v1, %v2417_v53  ;;  %v2439_v57 = vmul.f32 %v2435_v4, %v2421_v61 }
 0x9ea   : > { %v2440_v6 = vmul.f32 %v2436_v39, %v2423_v50  ;;  %v2442_v7 = vadd.f32 %v2438_v59, %v2419_v55  ;;  %v3635_v39 = vld [vmem:[#allocation10] sm:$0xff] (!%p3140_p9)  }
 0x9eb   : > { %v2445_v8 = vmul.f32 0.7978846, %v2441_v56  ;;  %v2443_v9 = vadd.f32 %v2439_v57, %v2421_v61  ;;  %v3897_v56 = vmov (!%p3140_p9), 0.0   ;;  %v3636_v57 = vld [vmem:[#allocation10 + $0x8] sm:$0xff] (!%p3140_p9)  }
 0x9ec   : > { %v2444_v10 = vadd.f32 %v2440_v6, %v2423_v50  ;;  %v2446_v12 = vmul.f32 0.7978846, %v2442_v7  ;;  %3376 = vmatprep.subr.bf16.mxu0 (!%p3140_p9), %v3897_v56  ;;  %v3637_v6 = vld [vmem:[#allocation10 + $0x10] sm:$0xff] (!%p3140_p9)   ;;  %v3638_v7 = vld [vmem:[#allocation10 + $0x18] sm:$0xff] (!%p3140_p9)  }
 0x9ed   : > { %3623 = vtanh.f32 %v2445_v8  ;;  %v2447_v13 = vmul.f32 0.7978846, %v2443_v9  ;;  %v3639_v8 = vld [vmem:[#allocation10 + $0x20] sm:$0xff] (!%p3140_p9)   ;;  %v3640_v9 = vld [vmem:[#allocation10 + $0x28] sm:$0xff] (!%p3140_p9)  }
 0x9ee   : > { %v2448_v5 = vmul.f32 0.7978846, %v2444_v10  ;;  %3625 = vtanh.f32 %v2446_v12  ;;  %v3641_v10 = vld [vmem:[#allocation10 + $0x30] sm:$0xff] (!%p3140_p9)  }
 0x9ef   : > { %3627 = vtanh.f32 %v2447_v13  ;;  %v3642_v13 = vld [vmem:[#allocation10 + $0x38] sm:$0xff] (!%p3140_p9)  }
 0x9f0   : > { %3629 = vtanh.f32 %v2448_v5 }
 0x9f7   : > { %v3624_v14 = vpop.eup %3623 }
 0x9f8   : > { %v3626_v16 = vpop.eup %3625  ;;  %v2453_v18 = vadd.f32 1.0, %v3624_v14 }
 0x9f9   : > { %v3628_v19 = vpop.eup %3627  ;;  %v2454_v11 = vadd.f32 1.0, %v3626_v16  ;;  %v3141_v16 = vld [vmem:[%s4767_s17] ss:$0 sm:$0xff] (!%p3140_p9) }
 0x9fa   : > { %v3630_v20 = vpop.eup %3629  ;;  %v2455_v24 = vadd.f32 1.0, %v3628_v19  ;;  %v2457_v22 = vmul.f32 %v2453_v18, %v2425_v21 }
 0x9fb   : > { %v2456_v27 = vadd.f32 1.0, %v3630_v20  ;;  %v2458_v29 = vmul.f32 %v2454_v11, %v2426_v25 }
 0x9fc   : > { %v2459_v30 = vmul.f32 %v2455_v24, %v2427_v23 }
 0x9fd   : > { %v2460_v32 = vmul.f32 %v2456_v27, %v2428_v26 }
 0x9fe   : > { %v2461_v34 = vpack.c.bf16 %v2459_v30, %v2457_v22 }
 0x9ff   : > { %v2462_v17 = vpack.c.bf16 %v2460_v32, %v2458_v29 }
 0xa01   : > { %2630 = vmatprep.mubr.bf16.mxu0 %v2462_v17 }
 0xa02   : > { %2631 = vmatmul.mubr.bf16.vlgmr.msra.gmra.mrb[32].mxu0 %v2461_v34 }
 0xa03   : > { %3377 = vmatpush3.bf16.msra.mxu0 (!%p3140_p9), %v3635_v39  ;;  %3392 = vmatprep.mubr.msk.bf16.mxu0 (!%p3140_p9), %vm3898_vm8, %v3897_v56 }
 0xa04   : > { %3378 = vmatprep.subr.bf16.mxu0 (!%p3140_p9), %v3897_v56 }
 0xa07   : > { %3379 = vmatpush3.bf16.msra.mxu0 (!%p3140_p9), %v3636_v57 }
 0xa08   : > { %3380 = vmatprep.subr.bf16.mxu0 (!%p3140_p9), %v3897_v56 }
 0xa0b   : > { %3381 = vmatpush3.bf16.msra.mxu0 (!%p3140_p9), %v3637_v6 }
 0xa0c   : > { %3382 = vmatprep.subr.bf16.mxu0 (!%p3140_p9), %v3897_v56 }
 0xa0f   : > { %3383 = vmatpush3.bf16.msra.mxu0 (!%p3140_p9), %v3638_v7 }
 0xa10   : > { %3384 = vmatprep.subr.bf16.mxu0 (!%p3140_p9), %v3897_v56 }
 0xa13   : > { %3385 = vmatpush3.bf16.msra.mxu0 (!%p3140_p9), %v3639_v8 }
 0xa14   : > { %3386 = vmatprep.subr.bf16.mxu0 (!%p3140_p9), %v3897_v56 }
 0xa17   : > { %3387 = vmatpush3.bf16.msra.mxu0 (!%p3140_p9), %v3640_v9 }
 0xa18   : > { %3388 = vmatprep.subr.bf16.mxu0 (!%p3140_p9), %v3897_v56 }
 0xa1b   : > { %3389 = vmatpush3.bf16.msra.mxu0 (!%p3140_p9), %v3641_v10 }
 0xa1c   : > { %3390 = vmatprep.subr.bf16.mxu0 (!%p3140_p9), %v3897_v56 }
 0xa1f   : > { %3391 = vmatpush3.bf16.msra.mxu0 (!%p3140_p9), %v3642_v13 }
 0xad5   : > { %v3225_v35 = vpop.f32.mrb[32].mxu0 }
 0xad6   : > { %v3226_v37 = vpop.f32.mrb[33].mxu0 }
 0xad7   : > { %v3227_v38 = vadd.f32 %v3226_v37, %v3225_v35  ;;  %v3228_v41 = vpop.f32.mrb[34].mxu0 }
 0xad8   : > { %v3229_v42 = vpop.f32.mrb[35].mxu0 }
 0xad9   : > { %v2633_v31 = vadd.f32 %v3227_v38, %v3121_v36  ;;  %v3230_v43 = vadd.f32 %v3229_v42, %v3228_v41 }
 0xadb   : > { %v2636_v44 = vadd.f32 %v3230_v43, %v3121_v36  ;;  %v2639_v45 = vadd.f32 %v2633_v31, %v4572_v15 }
 0xadd   : > { %2643 = vadd.xlane.f32.xlu0 %v2639_v45  ;;  %v2640_v46 = vadd.f32 %v2636_v44, %v4574_v33 }
 0xadf   : > { %2645 = vadd.xlane.f32.xlu1 %v2640_v46 }
 0xb6a   : > { %v2644_v28 = vpop.xlane.xlu0 %2643 }
 0xb6b   : > { %v2647_v47 = vmul.f32 0.0078125, %v2644_v28 }
 0xb6c   : > { %v2646_v48 = vpop.xlane.xlu1 %2645 }
 0xb6d   : > { %v2649_v40 = vsub.f32 %v2639_v45, %v2647_v47  ;;  %v2648_v51 = vmul.f32 0.0078125, %v2646_v48 }
 0xb6f   : > { %v2650_v52 = vsub.f32 %v2640_v46, %v2648_v51  ;;  %v2651_v53 = vmul.f32 %v2649_v40, %v2649_v40 }
 0xb71   : > { %2653 = vadd.xlane.f32.xlu0 %v2651_v53  ;;  %v2652_v54 = vmul.f32 %v2650_v52, %v2650_v52 }
 0xb73   : > { %2655 = vadd.xlane.f32.xlu1 %v2652_v54 }
 0xbfe   : > { %v2654_v55 = vpop.xlane.xlu0 %2653 }
 0xbff   : > { %v2657_v58 = vmul.f32 0.0078125, %v2654_v55 }
 0xc00   : > { %v2656_v60 = vpop.xlane.xlu1 %2655 }
 0xc01   : > { %v2659_v15 = vadd.f32 1e-05, %v2657_v58  ;;  %v2658_v61 = vmul.f32 0.0078125, %v2656_v60 }
 0xc03   : > { %3631 = vrsqrt.f32 %v2659_v15  ;;  %v2660_v33 = vadd.f32 1e-05, %v2658_v61 }
 0xc05   : > { %3633 = vrsqrt.f32 %v2660_v33 }
 0xc0d   : > { %v3632_v62 = vpop.eup %3631 }
 0xc0e   : > { %v2663_v50 = vmul.f32 %v3632_v62, %v2649_v40 }
 0xc0f   : > { %v3634_v63 = vpop.eup %3633 }
 0xc10   : > { %v2671_v2 = vmul.f32 %v3138_v49, %v2663_v50  ;;  %v2664_v3 = vmul.f32 %v3634_v63, %v2650_v52  ;;  %2686 = sbr.rel (%p3140_p9) target bundleno = 3325 (0xcfd), region = 112 }
 0xc12   : > { %v2679_v1 = vadd.f32 %v3139_v0, %v2671_v2  ;;  %v2672_v4 = vmul.f32 %v3138_v49, %v2664_v3 }
 0xc14   : > { %2681 = vst [vmem:[#allocation12] sm:$0xff] %v2679_v1  ;;  %v2680_v59 = vadd.f32 %v3139_v0, %v2672_v4 }
 0xc16   : > { %2682 = vst [vmem:[#allocation12 + $0x8] sm:$0xff] %v2680_v59  ;;  %v2688_v12 = vrot.slane (!%p3140_p9), %v2680_v59, 7 }
 0xc18   : > { %v2691_v5 = vsel %vm2690_vm9, %v2679_v1, %v2688_v12 }
 0xc19   : > { %v2692_v14 = vpack.c.bf16 %v2691_v5, %v2691_v5 }
 0xc1b   : > { %3393 = vmatmul.mubr.bf16.vlgmr.msra.gmra.mrb[0].mxu0 %v2692_v14 }
 0xcee   : > { %v2798_v18 = vpop.f32.mrb[0].mxu0 }
 0xcef   : > { %v2799_v19 = vadd.f32 %v3141_v16, %v2798_v18  ;;  %v3394_v11 = vpop.f32.mrb[1].mxu0 }
 0xcf0   : > { %v2801_v20 = vpop.f32.mrb[2].mxu0 }
 0xcf1   : > { %3643 = vtanh.f32 %v2799_v19  ;;  %v3395_v21 = vpop.f32.mrb[3].mxu0 }
 0xcfb   : > { %v3644_v23 = vpop.eup %3643 }
 0xcfc   : > { %2805 = vst [vmem:[#allocation13] sm:$0x3] %v3644_v23 }
 0xcfd PF: > { %p3433_p10 = scmp.eq.s32.totalorder %s4102_s18, 1  ;;  %s3899_s19 = smov [#allocation12]  }
 0xcfe   : > { %s2812_s22 = sshll.u32 %s3899_s19, 4  ;;  %s2813_s22 = int_to_ptr.vmem [resolvable:$true] %s2812_s22 }
 0xcff   : > { %s3775_s15 = scalar_lea.vmem %s2813_s22, 256  ;;  %p3782_p13 = scmp.lt.s32.totalorder %s2813_s22, %s2813_s22 }
 0xd00   : > { %p3776_p3 = scmp.ne.s32.totalorder %s2813_s22, %s3775_s15  ;;  %p3783_p11 = scmp.lt.s32.totalorder %s3775_s15, %s3775_s15 }
 0xd02   : > { %p3777_p7 = pnand %p3776_p3, %p3433_p10  ;;  %p3784_p2 = por %p3783_p11, %p3782_p13 }
 0xd04   : > { %p3778_p8 = pneg %p3777_p7 }
 0xd06   : > { %p3785_p12 = pnand %p3784_p2, %p3778_p8 }
 0xd08   : > { %3788 = shalt.err (!%p3785_p12)
}
 0xd09   : > { %s4768_s13 = sld [smem:[#allocation39_spill]] }
 0xd0f   : > { %s3789_s30 = scalar_lea.hbm %s4768_s13, 256 }
 0xd10   : > { %p3790_p1 = scmp.ne.s32.totalorder %s4768_s13, %s3789_s30  ;;  %p3795_p4 = scmp.lt.u32.totalorder %s3789_s30, %s4768_s13 }
 0xd12   : > { %p3791_p6 = pnand %p3790_p1, %p3433_p10 }
 0xd14   : > { %p3792_p0 = pneg %p3791_p6 }
 0xd16   : > { %p3797_p5 = pnand %p3795_p4, %p3792_p0 }
 0xd18   : > { %3800 = shalt.err (!%p3797_p5)
}
 0xd19   : > { %s3900_s4 = smov 128   ;;  %s3901_s12 = smov 8  }
 0xd1a   : > { %3409 = dma.vmem_to_hbm [thread:$0]  (%p3433_p10), %s2813_s22, 256, %s4768_s13, [#allocation6], %s3900_s4, %s3900_s4, %s3901_s12  }
 0xd1b   : > { %s3902_s29 = smov [#allocation13]  }
 0xd1c   : > { %s2826_s1 = sshll.u32 %s3902_s29, 4  ;;  %s2827_s1 = int_to_ptr.vmem [resolvable:$true] %s2826_s1 }
 0xd1d   : > { %s3801_s23 = scalar_lea.vmem %s2827_s1, 32  ;;  %p3808_p8 = scmp.lt.s32.totalorder %s2827_s1, %s2827_s1 }
 0xd1e   : > { %p3802_p9 = scmp.ne.s32.totalorder %s2827_s1, %s3801_s23  ;;  %p3809_p13 = scmp.lt.s32.totalorder %s3801_s23, %s3801_s23 }
 0xd20   : > { %p3803_p3 = pnand %p3802_p9, %p3433_p10  ;;  %p3810_p11 = por %p3809_p13, %p3808_p8 }
 0xd22   : > { %p3804_p7 = pneg %p3803_p3 }
 0xd24   : > { %p3811_p2 = pnand %p3810_p11, %p3804_p7 }
 0xd26   : > { %3814 = shalt.err (!%p3811_p2)
}
 0xd27   : > { %s4769_s27 = sld [smem:[#allocation40_spill]] }
 0xd2d   : > { %s3815_s24 = scalar_lea.hbm %s4769_s27, 32 }
 0xd2e   : > { %p3816_p12 = scmp.ne.s32.totalorder %s4769_s27, %s3815_s24  ;;  %p3821_p0 = scmp.lt.u32.totalorder %s3815_s24, %s4769_s27 }
 0xd30   : > { %p3817_p1 = pnand %p3816_p12, %p3433_p10 }
 0xd32   : > { %p3818_p6 = pneg %p3817_p1 }
 0xd34   : > { %p3823_p4 = pnand %p3821_p0, %p3818_p6 }
 0xd36   : > { %3826 = shalt.err (!%p3823_p4)
}
 0xd37   : > { %3411 = dma.vmem_to_hbm [thread:$0]  (%p3433_p10), %s2827_s1, 32, %s4769_s27, [#allocation14]  }
 0xd38   : > { %3858 = dma.done.wait (%p3433_p10), [#allocation6], 256  }
 0xd39   : > { %3860 = vsyncadd (%p3433_p10), [#allocation6], 4294967040 }
 0xd3a   : > { %3862 = dma.done.wait (%p3433_p10), [#allocation14], 32  }
 0xd3b   : > { %3864 = vsyncadd (%p3433_p10), [#allocation14], 4294967264 }
 0xd3c PF: > { %s4770_s24 = sld [smem:[#allocation22_spill]]  ;;  %s4771_s11 = sld [smem:[#allocation21_spill]] }
 0xd3d   : > { %s4772_s23 = sld [smem:[#allocation23_spill]]  ;;  %s4773_s22 = smov %s3871_s2 }
 0xd42   : > { %p42_p5 = scmp.ge.s32.totalorder %s4770_s24, 4   ;;  %s4774_s2 = smov %s4771_s11 }
 0xd44   :  { %44 = sbr.rel (!%p42_p5) target bundleno = 36 (0x24), region = 196 }
 0xd4b   :  { %2843 = vsyncpa [#allocation5], 1 }
 0xd4c   :  { %2845 = vsyncpa [#allocation5 + $0x1], 1 }
 0xd4d   :  { %2846 = vsyncpa [#allocation8], 1 }
 0xd4e   :  { %2848 = vsyncpa [#allocation8 + $0x1], 1 }
 0xd4f   :  { %2849 = vsyncpa [#allocation11], 1 }
 0xd50   :  { %2850 = vsyncpa [#allocation6], 1 }
 0xd51   :  { %2852 = vsyncpa [#allocation6 + $0x1], 1 }
 0xd52   :  { %2853 = vsyncpa [#allocation14], 1 }

</bundles_post_ra>
